<compile_context>
chip_gen: v7x
topology: tpu7x:2x2x1
jax: 0.10.0
libtpu: 0.0.40
codegen_flags: <defaults>
</compile_context>

<pallas_src>
import functools

import jax
import jax.numpy as jnp
from jax.experimental import pallas as pl
from jax.experimental.pallas import tpu as pltpu


# ----------------------------- Pallas kernel --------------------------------
def time_lstm_kernel(x_ref, w_ih0_ref, w_ref, b_ref, fc_w_ref, fc_b_ref,
                     out_ref, h_seq_ref, *,
                     seq_len, num_layers, hidden, compute_dtype):
    """LSTM recurrence (MXU matmuls, VPU/EUP gate math), LeakyReLU, FC, ReLU.

    x_ref    : (seq, size_in)        f32   raw input sequence (cast in-kernel)
    w_ih0_ref: (size_in, 4*H)        bf16  layer-0 W_ih^T, gates packed [i|f|g|o]
    w_ref    : (L, 2, H, 4*H)        bf16  [l,0]=W_ih^T (l>=1), [l,1]=W_hh^T
    b_ref    : (L, 1, 4*H)           f32   b_ih + b_hh
    fc_w_ref : (H, size_out)         bf16
    fc_b_ref : (1, size_out)         f32
    out_ref  : (1, size_out)         f32
    h_seq_ref: (seq, H) VMEM scratch f32   hidden sequence fed to next layer
    """
    H = hidden
    G = 4 * H

    # Lane mask selecting the g-gate (tanh) lanes; hoisted out of all loops
    # (JAX does not CSE broadcast_in_dim).
    lane = jax.lax.broadcasted_iota(jnp.int32, (1, G), 1)
    g_mask = (lane >= 2 * H) & (lane < 3 * H)

    h_last = None
    for l in range(num_layers):
        w_hh_t = w_ref[l, 1]                                     # (H, G)
        b = b_ref[l]                                             # (1, G) f32

        # Hoisted input projection for ALL timesteps of this layer (one M=seq
        # matmul instead of seq M=1 matmuls), bias folded in here.
        if l == 0:
            layer_in = x_ref[...].astype(compute_dtype)          # (seq, size_in)
            w_ih_t = w_ih0_ref[...]                              # (size_in, G)
        else:
            layer_in = h_seq_ref[...].astype(compute_dtype)      # (seq, H)
            w_ih_t = w_ref[l, 0]                                 # (H, G)
        pre = jnp.dot(layer_in, w_ih_t,
                      preferred_element_type=jnp.float32) + b    # (seq, G) f32

        h = jnp.zeros((1, H), jnp.float32)
        c = jnp.zeros((1, H), jnp.float32)
        for t in range(seq_len):
            # One N=G (=128) matmul per step; gates packed at H-lane stride.
            gates = pre[t:t + 1, :] + jnp.dot(
                h.astype(compute_dtype), w_hh_t,
                preferred_element_type=jnp.float32)              # (1, G) f32
            # sigmoid(x) = 0.5*tanh(0.5*x) + 0.5  -> one EUP tanh for all gates.
            scaled = jnp.where(g_mask, gates, 0.5 * gates)
            th = jnp.tanh(scaled)
            act = jnp.where(g_mask, th, 0.5 * th + 0.5)
            i_g = act[:, 0 * H:1 * H]
            f_g = act[:, 1 * H:2 * H]
            g_g = act[:, 2 * H:3 * H]
            o_g = act[:, 3 * H:4 * H]
            c = f_g * c + i_g * g_g
            h = o_g * jnp.tanh(c)
            if l + 1 < num_layers:
                h_seq_ref[pl.ds(t, 1), :] = h                    # next layer input
        h_last = h                                               # h_n[l]

    # Fused tail: LeakyReLU(0.01) -> FC -> ReLU.
    a = jnp.where(h_last >= 0, h_last, jnp.float32(0.01) * h_last)
    y = jnp.dot(a.astype(compute_dtype), fc_w_ref[...],
                preferred_element_type=jnp.float32) + fc_b_ref[...]
    out_ref[...] = jnp.maximum(y, 0.0)


# ----------------------- One-time parameter preparation ----------------------
def prepare_params(params, *, size_in, hidden_size, num_layers,
                   compute_dtype=jnp.bfloat16):
    """Transpose, pack gates at natural width, sum biases, stack, cast ONCE."""
    H = hidden_size
    G = 4 * H
    size_out = params["fc_w"].shape[0]

    w_ih0 = params["w_ih_0"].T.astype(compute_dtype)             # (size_in, G)

    w_layers, b_layers = [], []
    for l in range(num_layers):
        if l == 0:
            ih = jnp.zeros((H, G), jnp.float32)                  # unused slot
        else:
            ih = params[f"w_ih_{l}"].T.astype(jnp.float32)       # (H, G)
        hh = params[f"w_hh_{l}"].T.astype(jnp.float32)           # (H, G)
        w_layers.append(jnp.stack([ih, hh]))                     # (2, H, G)
        b = (params[f"b_ih_{l}"] + params[f"b_hh_{l}"]).astype(jnp.float32)
        b_layers.append(b.reshape(1, 1, G))

    return {
        "w_ih0": w_ih0,
        "w_all": jnp.stack(w_layers).astype(compute_dtype),      # (L, 2, H, G)
        "b_all": jnp.concatenate(b_layers, axis=0),              # (L, 1, G) f32
        "fc_w": params["fc_w"].T.astype(compute_dtype),          # (H, size_out)
        "fc_b": params["fc_b"].reshape(1, -1).astype(jnp.float32),
        "hidden": H, "size_out": size_out, "num_layers": num_layers,
        "size_in": size_in, "compute_dtype": compute_dtype,
    }


# ------------------------------- Wrapper -------------------------------------
def time_lstm_forward(x, prepped):
    seq_len, size_in = x.shape
    assert size_in == prepped["size_in"]
    H = prepped["hidden"]
    cd = prepped["compute_dtype"]
    size_out = prepped["size_out"]

    kernel = functools.partial(
        time_lstm_kernel, seq_len=seq_len, num_layers=prepped["num_layers"],
        hidden=H, compute_dtype=cd)

    out = pl.pallas_call(
        kernel,
        out_shape=jax.ShapeDtypeStruct((1, size_out), jnp.float32),
        in_specs=[pl.BlockSpec(memory_space=pltpu.MemorySpace.VMEM)] * 6,
        out_specs=pl.BlockSpec(memory_space=pltpu.MemorySpace.VMEM),
        scratch_shapes=[pltpu.VMEM((seq_len, H), jnp.float32)],
    )(x, prepped["w_ih0"], prepped["w_all"], prepped["b_all"],
      prepped["fc_w"], prepped["fc_b"])
    return out.reshape(size_out)


# ------------------------- Deterministic param init --------------------------
def init_params(key, size_in, size_out, hidden_size, num_layers):
    params = {}
    k_lstm = 1.0 / jnp.sqrt(hidden_size)
    for l in range(num_layers):
        in_l = size_in if l == 0 else hidden_size
        key, k1, k2, k3, k4 = jax.random.split(key, 5)
        params[f"w_ih_{l}"] = jax.random.uniform(k1, (4 * hidden_size, in_l),
                                                 jnp.float32, -k_lstm, k_lstm)
        params[f"w_hh_{l}"] = jax.random.uniform(k2, (4 * hidden_size, hidden_size),
                                                 jnp.float32, -k_lstm, k_lstm)
        params[f"b_ih_{l}"] = jax.random.uniform(k3, (4 * hidden_size,),
                                                 jnp.float32, -k_lstm, k_lstm)
        params[f"b_hh_{l}"] = jax.random.uniform(k4, (4 * hidden_size,),
                                                 jnp.float32, -k_lstm, k_lstm)
    k_fc = 1.0 / jnp.sqrt(hidden_size)
    key, k5, k6 = jax.random.split(key, 3)
    params["fc_w"] = jax.random.uniform(k5, (size_out, hidden_size),
                                        jnp.float32, -k_fc, k_fc)
    params["fc_b"] = jax.random.uniform(k6, (size_out,), jnp.float32, -k_fc, k_fc)
    return params


# --------------------------- Pure-JAX reference -------------------------------
def time_lstm_reference(x, params, *, hidden_size, num_layers,
                        matmul_dtype=jnp.float32):
    """f32 reference of the PyTorch module; matmul_dtype lets us also build a
    precision-matched (bf16-operand) reference for a tight kernel check."""
    H = hidden_size
    seq = x.astype(jnp.float32)
    h_last = None
    for l in range(num_layers):
        w_ih_t = params[f"w_ih_{l}"].T.astype(jnp.float32)
        w_hh_t = params[f"w_hh_{l}"].T.astype(jnp.float32)
        b = (params[f"b_ih_{l}"] + params[f"b_hh_{l}"]).astype(jnp.float32)
        h = jnp.zeros((H,), jnp.float32)
        c = jnp.zeros((H,), jnp.float32)
        outs = []
        for t in range(seq.shape[0]):
            g = (jnp.dot(seq[t].astype(matmul_dtype), w_ih_t.astype(matmul_dtype),
                         preferred_element_type=jnp.float32)
                 + jnp.dot(h.astype(matmul_dtype), w_hh_t.astype(matmul_dtype),
                           preferred_element_type=jnp.float32)
                 + b)
            i_g = jax.nn.sigmoid(g[0 * H:1 * H])
            f_g = jax.nn.sigmoid(g[1 * H:2 * H])
            g_g = jnp.tanh(g[2 * H:3 * H])
            o_g = jax.nn.sigmoid(g[3 * H:4 * H])
            c = f_g * c + i_g * g_g
            h = o_g * jnp.tanh(c)
            outs.append(h)
        seq = jnp.stack(outs)
        h_last = h
    act = jnp.where(h_last >= 0, h_last, 0.01 * h_last)
    y = jnp.dot(act.astype(matmul_dtype), params["fc_w"].T.astype(matmul_dtype),
                preferred_element_type=jnp.float32) + params["fc_b"]
    return jnp.maximum(y, 0.0)


if __name__ == "__main__":
    SEQ, SIZE_IN, HIDDEN, NUM_LAYERS, SIZE_OUT = 8, 16, 32, 2, 4

    key = jax.random.PRNGKey(0)
    key, kx = jax.random.split(key)
    x = jax.random.normal(kx, (SEQ, SIZE_IN), jnp.float32)   # (seq, size_in)
    params = init_params(key, SIZE_IN, SIZE_OUT, HIDDEN, NUM_LAYERS)

    prepped = prepare_params(params, size_in=SIZE_IN, hidden_size=HIDDEN,
                             num_layers=NUM_LAYERS, compute_dtype=jnp.bfloat16)

    fwd = jax.jit(lambda xx: time_lstm_forward(xx, prepped))
    out = jax.block_until_ready(fwd(x))
    assert out.shape == (SIZE_OUT,)

    # Tight check vs a precision-matched (bf16 matmul operands, f32 accum) reference.
    ref_matched = time_lstm_reference(x, params, hidden_size=HIDDEN,
                                      num_layers=NUM_LAYERS,
                                      matmul_dtype=jnp.bfloat16)
    assert jnp.allclose(out, ref_matched, atol=5e-3, rtol=5e-3), (out, ref_matched)

    # Looser check vs the exact f32 PyTorch-semantics reference (bf16 rounding noise).
    ref_f32 = time_lstm_reference(x, params, hidden_size=HIDDEN,
                                  num_layers=NUM_LAYERS,
                                  matmul_dtype=jnp.float32)
    assert jnp.allclose(out, ref_f32, atol=2e-2, rtol=2e-2), (out, ref_f32)

    print("KERNEL_OK")
</pallas_src>

<mosaic_0001>
module attributes {stable_mosaic.version = 11 : i64} {
  func.func @time_lstm_kernel(%arg0: memref<8x16xf32, #tpu.memory_space<vmem>>, %arg1: memref<16x128xbf16, #tpu.memory_space<vmem>>, %arg2: memref<2x2x32x128xbf16, #tpu.memory_space<vmem>>, %arg3: memref<2x1x128xf32, #tpu.memory_space<vmem>>, %arg4: memref<32x4xbf16, #tpu.memory_space<vmem>>, %arg5: memref<1x4xf32, #tpu.memory_space<vmem>>, %arg6: memref<1x4xf32, #tpu.memory_space<vmem>>, %arg7: memref<8x32xf32, #tpu.memory_space<vmem>>) attributes {dimension_semantics = [], scalar_prefetch = 0 : i64, scratch_operands = 1 : i64, tpu.core_type = #tpu.core_type<tc>} {
    %0 = tpu.iota {dimensions = array<i32: 1>} : vector<1x128xi32>
    %c64_i32 = arith.constant 64 : i32
    %1 = vector.broadcast %c64_i32 : i32 to vector<1x128xi32>
    %2 = arith.cmpi sge, %0, %1 : vector<1x128xi32>
    %c96_i32 = arith.constant 96 : i32
    %3 = vector.broadcast %c96_i32 : i32 to vector<1x128xi32>
    %4 = arith.cmpi slt, %0, %3 : vector<1x128xi32>
    %5 = arith.andi %2, %4 : vector<1x128xi1>
    %c0 = arith.constant 0 : index
    %c1 = arith.constant 1 : index
    %c0_0 = arith.constant 0 : index
    %c0_1 = arith.constant 0 : index
    %6 = vector.load %arg2[%c0, %c1, %c0_0, %c0_1] : memref<2x2x32x128xbf16, #tpu.memory_space<vmem>>, vector<1x1x32x128xbf16>
    %7 = vector.shape_cast %6 : vector<1x1x32x128xbf16> to vector<32x128xbf16>
    %c0_2 = arith.constant 0 : index
    %c0_3 = arith.constant 0 : index
    %c0_4 = arith.constant 0 : index
    %8 = vector.load %arg3[%c0_2, %c0_3, %c0_4] : memref<2x1x128xf32, #tpu.memory_space<vmem>>, vector<1x1x128xf32>
    %9 = vector.shape_cast %8 : vector<1x1x128xf32> to vector<1x128xf32>
    %c0_5 = arith.constant 0 : index
    %c0_6 = arith.constant 0 : index
    %10 = vector.load %arg0[%c0_5, %c0_6] : memref<8x16xf32, #tpu.memory_space<vmem>>, vector<8x16xf32>
    %11 = arith.truncf %10 : vector<8x16xf32> to vector<8x16xbf16>
    %c0_7 = arith.constant 0 : index
    %c0_8 = arith.constant 0 : index
    %12 = vector.load %arg1[%c0_7, %c0_8] : memref<16x128xbf16, #tpu.memory_space<vmem>>, vector<16x128xbf16>
    %cst = arith.constant dense<0.000000e+00> : vector<8x128xf32>
    %13 = tpu.matmul %11, %12, %cst {dimension_numbers = #tpu.dot_dimension_numbers<[1], [0], [0], [1], [0, 0, 1, 1], [], []>} : vector<8x16xbf16>, vector<16x128xbf16>, vector<8x128xf32> -> vector<8x128xf32>
    %14 = vector.broadcast %9 : vector<1x128xf32> to vector<8x128xf32>
    %15 = arith.addf %13, %14 : vector<8x128xf32>
    %cst_9 = arith.constant 0.000000e+00 : f32
    %16 = vector.broadcast %cst_9 : f32 to vector<1x32xf32>
    %cst_10 = arith.constant 0.000000e+00 : f32
    %17 = vector.broadcast %cst_10 : f32 to vector<1x32xf32>
    %18 = vector.extract_strided_slice %15 {offsets = [0, 0], sizes = [1, 128], strides = [1, 1]} : vector<8x128xf32> to vector<1x128xf32>
    %19 = arith.truncf %16 : vector<1x32xf32> to vector<1x32xbf16>
    %cst_11 = arith.constant dense<0.000000e+00> : vector<1x128xf32>
    %20 = tpu.matmul %19, %7, %cst_11 {dimension_numbers = #tpu.dot_dimension_numbers<[1], [0], [0], [1], [0, 0, 1, 1], [], []>} : vector<1x32xbf16>, vector<32x128xbf16>, vector<1x128xf32> -> vector<1x128xf32>
    %21 = arith.addf %18, %20 : vector<1x128xf32>
    %cst_12 = arith.constant 5.000000e-01 : f32
    %22 = vector.broadcast %cst_12 : f32 to vector<1x128xf32>
    %23 = arith.mulf %22, %21 : vector<1x128xf32>
    %24 = arith.select %5, %21, %23 : vector<1x128xi1>, vector<1x128xf32>
    %25 = math.tanh %24 : vector<1x128xf32>
    %cst_13 = arith.constant 5.000000e-01 : f32
    %26 = vector.broadcast %cst_13 : f32 to vector<1x128xf32>
    %27 = arith.mulf %26, %25 : vector<1x128xf32>
    %cst_14 = arith.constant 5.000000e-01 : f32
    %28 = vector.broadcast %cst_14 : f32 to vector<1x128xf32>
    %29 = arith.addf %27, %28 : vector<1x128xf32>
    %30 = arith.select %5, %25, %29 : vector<1x128xi1>, vector<1x128xf32>
    %31 = vector.extract_strided_slice %30 {offsets = [0, 0], sizes = [1, 32], strides = [1, 1]} : vector<1x128xf32> to vector<1x32xf32>
    %32 = vector.extract_strided_slice %30 {offsets = [0, 32], sizes = [1, 32], strides = [1, 1]} : vector<1x128xf32> to vector<1x32xf32>
    %33 = vector.extract_strided_slice %30 {offsets = [0, 64], sizes = [1, 32], strides = [1, 1]} : vector<1x128xf32> to vector<1x32xf32>
    %34 = vector.extract_strided_slice %30 {offsets = [0, 96], sizes = [1, 32], strides = [1, 1]} : vector<1x128xf32> to vector<1x32xf32>
    %35 = arith.mulf %32, %17 : vector<1x32xf32>
    %36 = arith.mulf %31, %33 : vector<1x32xf32>
    %37 = arith.addf %35, %36 : vector<1x32xf32>
    %38 = math.tanh %37 : vector<1x32xf32>
    %39 = arith.mulf %34, %38 : vector<1x32xf32>
    %c0_15 = arith.constant 0 : index
    %c0_16 = arith.constant 0 : index
    %40 = vector.load %arg7[%c0_15, %c0_16] : memref<8x32xf32, #tpu.memory_space<vmem>>, vector<1x32xf32>
    tpu.vector_store %arg7[%c0_15, %c0_16], %39 {strides = array<i32>} : memref<8x32xf32, #tpu.memory_space<vmem>>, vector<1x32xf32>,
    %41 = vector.extract_strided_slice %15 {offsets = [1, 0], sizes = [1, 128], strides = [1, 1]} : vector<8x128xf32> to vector<1x128xf32>
    %42 = arith.truncf %39 : vector<1x32xf32> to vector<1x32xbf16>
    %cst_17 = arith.constant dense<0.000000e+00> : vector<1x128xf32>
    %43 = tpu.matmul %42, %7, %cst_17 {dimension_numbers = #tpu.dot_dimension_numbers<[1], [0], [0], [1], [0, 0, 1, 1], [], []>} : vector<1x32xbf16>, vector<32x128xbf16>, vector<1x128xf32> -> vector<1x128xf32>
    %44 = arith.addf %41, %43 : vector<1x128xf32>
    %cst_18 = arith.constant 5.000000e-01 : f32
    %45 = vector.broadcast %cst_18 : f32 to vector<1x128xf32>
    %46 = arith.mulf %45, %44 : vector<1x128xf32>
    %47 = arith.select %5, %44, %46 : vector<1x128xi1>, vector<1x128xf32>
    %48 = math.tanh %47 : vector<1x128xf32>
    %cst_19 = arith.constant 5.000000e-01 : f32
    %49 = vector.broadcast %cst_19 : f32 to vector<1x128xf32>
    %50 = arith.mulf %49, %48 : vector<1x128xf32>
    %cst_20 = arith.constant 5.000000e-01 : f32
    %51 = vector.broadcast %cst_20 : f32 to vector<1x128xf32>
    %52 = arith.addf %50, %51 : vector<1x128xf32>
    %53 = arith.select %5, %48, %52 : vector<1x128xi1>, vector<1x128xf32>
    %54 = vector.extract_strided_slice %53 {offsets = [0, 0], sizes = [1, 32], strides = [1, 1]} : vector<1x128xf32> to vector<1x32xf32>
    %55 = vector.extract_strided_slice %53 {offsets = [0, 32], sizes = [1, 32], strides = [1, 1]} : vector<1x128xf32> to vector<1x32xf32>
    %56 = vector.extract_strided_slice %53 {offsets = [0, 64], sizes = [1, 32], strides = [1, 1]} : vector<1x128xf32> to vector<1x32xf32>
    %57 = vector.extract_strided_slice %53 {offsets = [0, 96], sizes = [1, 32], strides = [1, 1]} : vector<1x128xf32> to vector<1x32xf32>
    %58 = arith.mulf %55, %37 : vector<1x32xf32>
    %59 = arith.mulf %54, %56 : vector<1x32xf32>
    %60 = arith.addf %58, %59 : vector<1x32xf32>
    %61 = math.tanh %60 : vector<1x32xf32>
    %62 = arith.mulf %57, %61 : vector<1x32xf32>
    %c1_21 = arith.constant 1 : index
    %c0_22 = arith.constant 0 : index
    %63 = vector.load %arg7[%c1_21, %c0_22] : memref<8x32xf32, #tpu.memory_space<vmem>>, vector<1x32xf32>
    tpu.vector_store %arg7[%c1_21, %c0_22], %62 {strides = array<i32>} : memref<8x32xf32, #tpu.memory_space<vmem>>, vector<1x32xf32>,
    %64 = vector.extract_strided_slice %15 {offsets = [2, 0], sizes = [1, 128], strides = [1, 1]} : vector<8x128xf32> to vector<1x128xf32>
    %65 = arith.truncf %62 : vector<1x32xf32> to vector<1x32xbf16>
    %cst_23 = arith.constant dense<0.000000e+00> : vector<1x128xf32>
    %66 = tpu.matmul %65, %7, %cst_23 {dimension_numbers = #tpu.dot_dimension_numbers<[1], [0], [0], [1], [0, 0, 1, 1], [], []>} : vector<1x32xbf16>, vector<32x128xbf16>, vector<1x128xf32> -> vector<1x128xf32>
    %67 = arith.addf %64, %66 : vector<1x128xf32>
    %cst_24 = arith.constant 5.000000e-01 : f32
    %68 = vector.broadcast %cst_24 : f32 to vector<1x128xf32>
    %69 = arith.mulf %68, %67 : vector<1x128xf32>
    %70 = arith.select %5, %67, %69 : vector<1x128xi1>, vector<1x128xf32>
    %71 = math.tanh %70 : vector<1x128xf32>
    %cst_25 = arith.constant 5.000000e-01 : f32
    %72 = vector.broadcast %cst_25 : f32 to vector<1x128xf32>
    %73 = arith.mulf %72, %71 : vector<1x128xf32>
    %cst_26 = arith.constant 5.000000e-01 : f32
    %74 = vector.broadcast %cst_26 : f32 to vector<1x128xf32>
    %75 = arith.addf %73, %74 : vector<1x128xf32>
    %76 = arith.select %5, %71, %75 : vector<1x128xi1>, vector<1x128xf32>
    %77 = vector.extract_strided_slice %76 {offsets = [0, 0], sizes = [1, 32], strides = [1, 1]} : vector<1x128xf32> to vector<1x32xf32>
    %78 = vector.extract_strided_slice %76 {offsets = [0, 32], sizes = [1, 32], strides = [1, 1]} : vector<1x128xf32> to vector<1x32xf32>
    %79 = vector.extract_strided_slice %76 {offsets = [0, 64], sizes = [1, 32], strides = [1, 1]} : vector<1x128xf32> to vector<1x32xf32>
    %80 = vector.extract_strided_slice %76 {offsets = [0, 96], sizes = [1, 32], strides = [1, 1]} : vector<1x128xf32> to vector<1x32xf32>
    %81 = arith.mulf %78, %60 : vector<1x32xf32>
    %82 = arith.mulf %77, %79 : vector<1x32xf32>
    %83 = arith.addf %81, %82 : vector<1x32xf32>
    %84 = math.tanh %83 : vector<1x32xf32>
    %85 = arith.mulf %80, %84 : vector<1x32xf32>
    %c2 = arith.constant 2 : index
    %c0_27 = arith.constant 0 : index
    %86 = vector.load %arg7[%c2, %c0_27] : memref<8x32xf32, #tpu.memory_space<vmem>>, vector<1x32xf32>
    tpu.vector_store %arg7[%c2, %c0_27], %85 {strides = array<i32>} : memref<8x32xf32, #tpu.memory_space<vmem>>, vector<1x32xf32>,
    %87 = vector.extract_strided_slice %15 {offsets = [3, 0], sizes = [1, 128], strides = [1, 1]} : vector<8x128xf32> to vector<1x128xf32>
    %88 = arith.truncf %85 : vector<1x32xf32> to vector<1x32xbf16>
    %cst_28 = arith.constant dense<0.000000e+00> : vector<1x128xf32>
    %89 = tpu.matmul %88, %7, %cst_28 {dimension_numbers = #tpu.dot_dimension_numbers<[1], [0], [0], [1], [0, 0, 1, 1], [], []>} : vector<1x32xbf16>, vector<32x128xbf16>, vector<1x128xf32> -> vector<1x128xf32>
    %90 = arith.addf %87, %89 : vector<1x128xf32>
    %cst_29 = arith.constant 5.000000e-01 : f32
    %91 = vector.broadcast %cst_29 : f32 to vector<1x128xf32>
    %92 = arith.mulf %91, %90 : vector<1x128xf32>
    %93 = arith.select %5, %90, %92 : vector<1x128xi1>, vector<1x128xf32>
    %94 = math.tanh %93 : vector<1x128xf32>
    %cst_30 = arith.constant 5.000000e-01 : f32
    %95 = vector.broadcast %cst_30 : f32 to vector<1x128xf32>
    %96 = arith.mulf %95, %94 : vector<1x128xf32>
    %cst_31 = arith.constant 5.000000e-01 : f32
    %97 = vector.broadcast %cst_31 : f32 to vector<1x128xf32>
    %98 = arith.addf %96, %97 : vector<1x128xf32>
    %99 = arith.select %5, %94, %98 : vector<1x128xi1>, vector<1x128xf32>
    %100 = vector.extract_strided_slice %99 {offsets = [0, 0], sizes = [1, 32], strides = [1, 1]} : vector<1x128xf32> to vector<1x32xf32>
    %101 = vector.extract_strided_slice %99 {offsets = [0, 32], sizes = [1, 32], strides = [1, 1]} : vector<1x128xf32> to vector<1x32xf32>
    %102 = vector.extract_strided_slice %99 {offsets = [0, 64], sizes = [1, 32], strides = [1, 1]} : vector<1x128xf32> to vector<1x32xf32>
    %103 = vector.extract_strided_slice %99 {offsets = [0, 96], sizes = [1, 32], strides = [1, 1]} : vector<1x128xf32> to vector<1x32xf32>
    %104 = arith.mulf %101, %83 : vector<1x32xf32>
    %105 = arith.mulf %100, %102 : vector<1x32xf32>
    %106 = arith.addf %104, %105 : vector<1x32xf32>
    %107 = math.tanh %106 : vector<1x32xf32>
    %108 = arith.mulf %103, %107 : vector<1x32xf32>
    %c3 = arith.constant 3 : index
    %c0_32 = arith.constant 0 : index
    %109 = vector.load %arg7[%c3, %c0_32] : memref<8x32xf32, #tpu.memory_space<vmem>>, vector<1x32xf32>
    tpu.vector_store %arg7[%c3, %c0_32], %108 {strides = array<i32>} : memref<8x32xf32, #tpu.memory_space<vmem>>, vector<1x32xf32>,
    %110 = vector.extract_strided_slice %15 {offsets = [4, 0], sizes = [1, 128], strides = [1, 1]} : vector<8x128xf32> to vector<1x128xf32>
    %111 = arith.truncf %108 : vector<1x32xf32> to vector<1x32xbf16>
    %cst_33 = arith.constant dense<0.000000e+00> : vector<1x128xf32>
    %112 = tpu.matmul %111, %7, %cst_33 {dimension_numbers = #tpu.dot_dimension_numbers<[1], [0], [0], [1], [0, 0, 1, 1], [], []>} : vector<1x32xbf16>, vector<32x128xbf16>, vector<1x128xf32> -> vector<1x128xf32>
    %113 = arith.addf %110, %112 : vector<1x128xf32>
    %cst_34 = arith.constant 5.000000e-01 : f32
    %114 = vector.broadcast %cst_34 : f32 to vector<1x128xf32>
    %115 = arith.mulf %114, %113 : vector<1x128xf32>
    %116 = arith.select %5, %113, %115 : vector<1x128xi1>, vector<1x128xf32>
    %117 = math.tanh %116 : vector<1x128xf32>
    %cst_35 = arith.constant 5.000000e-01 : f32
    %118 = vector.broadcast %cst_35 : f32 to vector<1x128xf32>
    %119 = arith.mulf %118, %117 : vector<1x128xf32>
    %cst_36 = arith.constant 5.000000e-01 : f32
    %120 = vector.broadcast %cst_36 : f32 to vector<1x128xf32>
    %121 = arith.addf %119, %120 : vector<1x128xf32>
    %122 = arith.select %5, %117, %121 : vector<1x128xi1>, vector<1x128xf32>
    %123 = vector.extract_strided_slice %122 {offsets = [0, 0], sizes = [1, 32], strides = [1, 1]} : vector<1x128xf32> to vector<1x32xf32>
    %124 = vector.extract_strided_slice %122 {offsets = [0, 32], sizes = [1, 32], strides = [1, 1]} : vector<1x128xf32> to vector<1x32xf32>
    %125 = vector.extract_strided_slice %122 {offsets = [0, 64], sizes = [1, 32], strides = [1, 1]} : vector<1x128xf32> to vector<1x32xf32>
    %126 = vector.extract_strided_slice %122 {offsets = [0, 96], sizes = [1, 32], strides = [1, 1]} : vector<1x128xf32> to vector<1x32xf32>
    %127 = arith.mulf %124, %106 : vector<1x32xf32>
    %128 = arith.mulf %123, %125 : vector<1x32xf32>
    %129 = arith.addf %127, %128 : vector<1x32xf32>
    %130 = math.tanh %129 : vector<1x32xf32>
    %131 = arith.mulf %126, %130 : vector<1x32xf32>
    %c4 = arith.constant 4 : index
    %c0_37 = arith.constant 0 : index
    %132 = vector.load %arg7[%c4, %c0_37] : memref<8x32xf32, #tpu.memory_space<vmem>>, vector<1x32xf32>
    tpu.vector_store %arg7[%c4, %c0_37], %131 {strides = array<i32>} : memref<8x32xf32, #tpu.memory_space<vmem>>, vector<1x32xf32>,
    %133 = vector.extract_strided_slice %15 {offsets = [5, 0], sizes = [1, 128], strides = [1, 1]} : vector<8x128xf32> to vector<1x128xf32>
    %134 = arith.truncf %131 : vector<1x32xf32> to vector<1x32xbf16>
    %cst_38 = arith.constant dense<0.000000e+00> : vector<1x128xf32>
    %135 = tpu.matmul %134, %7, %cst_38 {dimension_numbers = #tpu.dot_dimension_numbers<[1], [0], [0], [1], [0, 0, 1, 1], [], []>} : vector<1x32xbf16>, vector<32x128xbf16>, vector<1x128xf32> -> vector<1x128xf32>
    %136 = arith.addf %133, %135 : vector<1x128xf32>
    %cst_39 = arith.constant 5.000000e-01 : f32
    %137 = vector.broadcast %cst_39 : f32 to vector<1x128xf32>
    %138 = arith.mulf %137, %136 : vector<1x128xf32>
    %139 = arith.select %5, %136, %138 : vector<1x128xi1>, vector<1x128xf32>
    %140 = math.tanh %139 : vector<1x128xf32>
    %cst_40 = arith.constant 5.000000e-01 : f32
    %141 = vector.broadcast %cst_40 : f32 to vector<1x128xf32>
    %142 = arith.mulf %141, %140 : vector<1x128xf32>
    %cst_41 = arith.constant 5.000000e-01 : f32
    %143 = vector.broadcast %cst_41 : f32 to vector<1x128xf32>
    %144 = arith.addf %142, %143 : vector<1x128xf32>
    %145 = arith.select %5, %140, %144 : vector<1x128xi1>, vector<1x128xf32>
    %146 = vector.extract_strided_slice %145 {offsets = [0, 0], sizes = [1, 32], strides = [1, 1]} : vector<1x128xf32> to vector<1x32xf32>
    %147 = vector.extract_strided_slice %145 {offsets = [0, 32], sizes = [1, 32], strides = [1, 1]} : vector<1x128xf32> to vector<1x32xf32>
    %148 = vector.extract_strided_slice %145 {offsets = [0, 64], sizes = [1, 32], strides = [1, 1]} : vector<1x128xf32> to vector<1x32xf32>
    %149 = vector.extract_strided_slice %145 {offsets = [0, 96], sizes = [1, 32], strides = [1, 1]} : vector<1x128xf32> to vector<1x32xf32>
    %150 = arith.mulf %147, %129 : vector<1x32xf32>
    %151 = arith.mulf %146, %148 : vector<1x32xf32>
    %152 = arith.addf %150, %151 : vector<1x32xf32>
    %153 = math.tanh %152 : vector<1x32xf32>
    %154 = arith.mulf %149, %153 : vector<1x32xf32>
    %c5 = arith.constant 5 : index
    %c0_42 = arith.constant 0 : index
    %155 = vector.load %arg7[%c5, %c0_42] : memref<8x32xf32, #tpu.memory_space<vmem>>, vector<1x32xf32>
    tpu.vector_store %arg7[%c5, %c0_42], %154 {strides = array<i32>} : memref<8x32xf32, #tpu.memory_space<vmem>>, vector<1x32xf32>,
    %156 = vector.extract_strided_slice %15 {offsets = [6, 0], sizes = [1, 128], strides = [1, 1]} : vector<8x128xf32> to vector<1x128xf32>
    %157 = arith.truncf %154 : vector<1x32xf32> to vector<1x32xbf16>
    %cst_43 = arith.constant dense<0.000000e+00> : vector<1x128xf32>
    %158 = tpu.matmul %157, %7, %cst_43 {dimension_numbers = #tpu.dot_dimension_numbers<[1], [0], [0], [1], [0, 0, 1, 1], [], []>} : vector<1x32xbf16>, vector<32x128xbf16>, vector<1x128xf32> -> vector<1x128xf32>
    %159 = arith.addf %156, %158 : vector<1x128xf32>
    %cst_44 = arith.constant 5.000000e-01 : f32
    %160 = vector.broadcast %cst_44 : f32 to vector<1x128xf32>
    %161 = arith.mulf %160, %159 : vector<1x128xf32>
    %162 = arith.select %5, %159, %161 : vector<1x128xi1>, vector<1x128xf32>
    %163 = math.tanh %162 : vector<1x128xf32>
    %cst_45 = arith.constant 5.000000e-01 : f32
    %164 = vector.broadcast %cst_45 : f32 to vector<1x128xf32>
    %165 = arith.mulf %164, %163 : vector<1x128xf32>
    %cst_46 = arith.constant 5.000000e-01 : f32
    %166 = vector.broadcast %cst_46 : f32 to vector<1x128xf32>
    %167 = arith.addf %165, %166 : vector<1x128xf32>
    %168 = arith.select %5, %163, %167 : vector<1x128xi1>, vector<1x128xf32>
    %169 = vector.extract_strided_slice %168 {offsets = [0, 0], sizes = [1, 32], strides = [1, 1]} : vector<1x128xf32> to vector<1x32xf32>
    %170 = vector.extract_strided_slice %168 {offsets = [0, 32], sizes = [1, 32], strides = [1, 1]} : vector<1x128xf32> to vector<1x32xf32>
    %171 = vector.extract_strided_slice %168 {offsets = [0, 64], sizes = [1, 32], strides = [1, 1]} : vector<1x128xf32> to vector<1x32xf32>
    %172 = vector.extract_strided_slice %168 {offsets = [0, 96], sizes = [1, 32], strides = [1, 1]} : vector<1x128xf32> to vector<1x32xf32>
    %173 = arith.mulf %170, %152 : vector<1x32xf32>
    %174 = arith.mulf %169, %171 : vector<1x32xf32>
    %175 = arith.addf %173, %174 : vector<1x32xf32>
    %176 = math.tanh %175 : vector<1x32xf32>
    %177 = arith.mulf %172, %176 : vector<1x32xf32>
    %c6 = arith.constant 6 : index
    %c0_47 = arith.constant 0 : index
    %178 = vector.load %arg7[%c6, %c0_47] : memref<8x32xf32, #tpu.memory_space<vmem>>, vector<1x32xf32>
    tpu.vector_store %arg7[%c6, %c0_47], %177 {strides = array<i32>} : memref<8x32xf32, #tpu.memory_space<vmem>>, vector<1x32xf32>,
    %179 = vector.extract_strided_slice %15 {offsets = [7, 0], sizes = [1, 128], strides = [1, 1]} : vector<8x128xf32> to vector<1x128xf32>
    %180 = arith.truncf %177 : vector<1x32xf32> to vector<1x32xbf16>
    %cst_48 = arith.constant dense<0.000000e+00> : vector<1x128xf32>
    %181 = tpu.matmul %180, %7, %cst_48 {dimension_numbers = #tpu.dot_dimension_numbers<[1], [0], [0], [1], [0, 0, 1, 1], [], []>} : vector<1x32xbf16>, vector<32x128xbf16>, vector<1x128xf32> -> vector<1x128xf32>
    %182 = arith.addf %179, %181 : vector<1x128xf32>
    %cst_49 = arith.constant 5.000000e-01 : f32
    %183 = vector.broadcast %cst_49 : f32 to vector<1x128xf32>
    %184 = arith.mulf %183, %182 : vector<1x128xf32>
    %185 = arith.select %5, %182, %184 : vector<1x128xi1>, vector<1x128xf32>
    %186 = math.tanh %185 : vector<1x128xf32>
    %cst_50 = arith.constant 5.000000e-01 : f32
    %187 = vector.broadcast %cst_50 : f32 to vector<1x128xf32>
    %188 = arith.mulf %187, %186 : vector<1x128xf32>
    %cst_51 = arith.constant 5.000000e-01 : f32
    %189 = vector.broadcast %cst_51 : f32 to vector<1x128xf32>
    %190 = arith.addf %188, %189 : vector<1x128xf32>
    %191 = arith.select %5, %186, %190 : vector<1x128xi1>, vector<1x128xf32>
    %192 = vector.extract_strided_slice %191 {offsets = [0, 0], sizes = [1, 32], strides = [1, 1]} : vector<1x128xf32> to vector<1x32xf32>
    %193 = vector.extract_strided_slice %191 {offsets = [0, 32], sizes = [1, 32], strides = [1, 1]} : vector<1x128xf32> to vector<1x32xf32>
    %194 = vector.extract_strided_slice %191 {offsets = [0, 64], sizes = [1, 32], strides = [1, 1]} : vector<1x128xf32> to vector<1x32xf32>
    %195 = vector.extract_strided_slice %191 {offsets = [0, 96], sizes = [1, 32], strides = [1, 1]} : vector<1x128xf32> to vector<1x32xf32>
    %196 = arith.mulf %193, %175 : vector<1x32xf32>
    %197 = arith.mulf %192, %194 : vector<1x32xf32>
    %198 = arith.addf %196, %197 : vector<1x32xf32>
    %199 = math.tanh %198 : vector<1x32xf32>
    %200 = arith.mulf %195, %199 : vector<1x32xf32>
    %c7 = arith.constant 7 : index
    %c0_52 = arith.constant 0 : index
    %201 = vector.load %arg7[%c7, %c0_52] : memref<8x32xf32, #tpu.memory_space<vmem>>, vector<1x32xf32>
    tpu.vector_store %arg7[%c7, %c0_52], %200 {strides = array<i32>} : memref<8x32xf32, #tpu.memory_space<vmem>>, vector<1x32xf32>,
    %c1_53 = arith.constant 1 : index
    %c1_54 = arith.constant 1 : index
    %c0_55 = arith.constant 0 : index
    %c0_56 = arith.constant 0 : index
    %202 = vector.load %arg2[%c1_53, %c1_54, %c0_55, %c0_56] : memref<2x2x32x128xbf16, #tpu.memory_space<vmem>>, vector<1x1x32x128xbf16>
    %203 = vector.shape_cast %202 : vector<1x1x32x128xbf16> to vector<32x128xbf16>
    %c1_57 = arith.constant 1 : index
    %c0_58 = arith.constant 0 : index
    %c0_59 = arith.constant 0 : index
    %204 = vector.load %arg3[%c1_57, %c0_58, %c0_59] : memref<2x1x128xf32, #tpu.memory_space<vmem>>, vector<1x1x128xf32>
    %205 = vector.shape_cast %204 : vector<1x1x128xf32> to vector<1x128xf32>
    %c0_60 = arith.constant 0 : index
    %c0_61 = arith.constant 0 : index
    %206 = vector.load %arg7[%c0_60, %c0_61] : memref<8x32xf32, #tpu.memory_space<vmem>>, vector<8x32xf32>
    %207 = arith.truncf %206 : vector<8x32xf32> to vector<8x32xbf16>
    %c1_62 = arith.constant 1 : index
    %c0_63 = arith.constant 0 : index
    %c0_64 = arith.constant 0 : index
    %c0_65 = arith.constant 0 : index
    %208 = vector.load %arg2[%c1_62, %c0_63, %c0_64, %c0_65] : memref<2x2x32x128xbf16, #tpu.memory_space<vmem>>, vector<1x1x32x128xbf16>
    %209 = vector.shape_cast %208 : vector<1x1x32x128xbf16> to vector<32x128xbf16>
    %cst_66 = arith.constant dense<0.000000e+00> : vector<8x128xf32>
    %210 = tpu.matmul %207, %209, %cst_66 {dimension_numbers = #tpu.dot_dimension_numbers<[1], [0], [0], [1], [0, 0, 1, 1], [], []>} : vector<8x32xbf16>, vector<32x128xbf16>, vector<8x128xf32> -> vector<8x128xf32>
    %211 = vector.broadcast %205 : vector<1x128xf32> to vector<8x128xf32>
    %212 = arith.addf %210, %211 : vector<8x128xf32>
    %cst_67 = arith.constant 0.000000e+00 : f32
    %213 = vector.broadcast %cst_67 : f32 to vector<1x32xf32>
    %cst_68 = arith.constant 0.000000e+00 : f32
    %214 = vector.broadcast %cst_68 : f32 to vector<1x32xf32>
    %215 = vector.extract_strided_slice %212 {offsets = [0, 0], sizes = [1, 128], strides = [1, 1]} : vector<8x128xf32> to vector<1x128xf32>
    %216 = arith.truncf %213 : vector<1x32xf32> to vector<1x32xbf16>
    %cst_69 = arith.constant dense<0.000000e+00> : vector<1x128xf32>
    %217 = tpu.matmul %216, %203, %cst_69 {dimension_numbers = #tpu.dot_dimension_numbers<[1], [0], [0], [1], [0, 0, 1, 1], [], []>} : vector<1x32xbf16>, vector<32x128xbf16>, vector<1x128xf32> -> vector<1x128xf32>
    %218 = arith.addf %215, %217 : vector<1x128xf32>
    %cst_70 = arith.constant 5.000000e-01 : f32
    %219 = vector.broadcast %cst_70 : f32 to vector<1x128xf32>
    %220 = arith.mulf %219, %218 : vector<1x128xf32>
    %221 = arith.select %5, %218, %220 : vector<1x128xi1>, vector<1x128xf32>
    %222 = math.tanh %221 : vector<1x128xf32>
    %cst_71 = arith.constant 5.000000e-01 : f32
    %223 = vector.broadcast %cst_71 : f32 to vector<1x128xf32>
    %224 = arith.mulf %223, %222 : vector<1x128xf32>
    %cst_72 = arith.constant 5.000000e-01 : f32
    %225 = vector.broadcast %cst_72 : f32 to vector<1x128xf32>
    %226 = arith.addf %224, %225 : vector<1x128xf32>
    %227 = arith.select %5, %222, %226 : vector<1x128xi1>, vector<1x128xf32>
    %228 = vector.extract_strided_slice %227 {offsets = [0, 0], sizes = [1, 32], strides = [1, 1]} : vector<1x128xf32> to vector<1x32xf32>
    %229 = vector.extract_strided_slice %227 {offsets = [0, 32], sizes = [1, 32], strides = [1, 1]} : vector<1x128xf32> to vector<1x32xf32>
    %230 = vector.extract_strided_slice %227 {offsets = [0, 64], sizes = [1, 32], strides = [1, 1]} : vector<1x128xf32> to vector<1x32xf32>
    %231 = vector.extract_strided_slice %227 {offsets = [0, 96], sizes = [1, 32], strides = [1, 1]} : vector<1x128xf32> to vector<1x32xf32>
    %232 = arith.mulf %229, %214 : vector<1x32xf32>
    %233 = arith.mulf %228, %230 : vector<1x32xf32>
    %234 = arith.addf %232, %233 : vector<1x32xf32>
    %235 = math.tanh %234 : vector<1x32xf32>
    %236 = arith.mulf %231, %235 : vector<1x32xf32>
    %237 = vector.extract_strided_slice %212 {offsets = [1, 0], sizes = [1, 128], strides = [1, 1]} : vector<8x128xf32> to vector<1x128xf32>
    %238 = arith.truncf %236 : vector<1x32xf32> to vector<1x32xbf16>
    %cst_73 = arith.constant dense<0.000000e+00> : vector<1x128xf32>
    %239 = tpu.matmul %238, %203, %cst_73 {dimension_numbers = #tpu.dot_dimension_numbers<[1], [0], [0], [1], [0, 0, 1, 1], [], []>} : vector<1x32xbf16>, vector<32x128xbf16>, vector<1x128xf32> -> vector<1x128xf32>
    %240 = arith.addf %237, %239 : vector<1x128xf32>
    %cst_74 = arith.constant 5.000000e-01 : f32
    %241 = vector.broadcast %cst_74 : f32 to vector<1x128xf32>
    %242 = arith.mulf %241, %240 : vector<1x128xf32>
    %243 = arith.select %5, %240, %242 : vector<1x128xi1>, vector<1x128xf32>
    %244 = math.tanh %243 : vector<1x128xf32>
    %cst_75 = arith.constant 5.000000e-01 : f32
    %245 = vector.broadcast %cst_75 : f32 to vector<1x128xf32>
    %246 = arith.mulf %245, %244 : vector<1x128xf32>
    %cst_76 = arith.constant 5.000000e-01 : f32
    %247 = vector.broadcast %cst_76 : f32 to vector<1x128xf32>
    %248 = arith.addf %246, %247 : vector<1x128xf32>
    %249 = arith.select %5, %244, %248 : vector<1x128xi1>, vector<1x128xf32>
    %250 = vector.extract_strided_slice %249 {offsets = [0, 0], sizes = [1, 32], strides = [1, 1]} : vector<1x128xf32> to vector<1x32xf32>
    %251 = vector.extract_strided_slice %249 {offsets = [0, 32], sizes = [1, 32], strides = [1, 1]} : vector<1x128xf32> to vector<1x32xf32>
    %252 = vector.extract_strided_slice %249 {offsets = [0, 64], sizes = [1, 32], strides = [1, 1]} : vector<1x128xf32> to vector<1x32xf32>
    %253 = vector.extract_strided_slice %249 {offsets = [0, 96], sizes = [1, 32], strides = [1, 1]} : vector<1x128xf32> to vector<1x32xf32>
    %254 = arith.mulf %251, %234 : vector<1x32xf32>
    %255 = arith.mulf %250, %252 : vector<1x32xf32>
    %256 = arith.addf %254, %255 : vector<1x32xf32>
    %257 = math.tanh %256 : vector<1x32xf32>
    %258 = arith.mulf %253, %257 : vector<1x32xf32>
    %259 = vector.extract_strided_slice %212 {offsets = [2, 0], sizes = [1, 128], strides = [1, 1]} : vector<8x128xf32> to vector<1x128xf32>
    %260 = arith.truncf %258 : vector<1x32xf32> to vector<1x32xbf16>
    %cst_77 = arith.constant dense<0.000000e+00> : vector<1x128xf32>
    %261 = tpu.matmul %260, %203, %cst_77 {dimension_numbers = #tpu.dot_dimension_numbers<[1], [0], [0], [1], [0, 0, 1, 1], [], []>} : vector<1x32xbf16>, vector<32x128xbf16>, vector<1x128xf32> -> vector<1x128xf32>
    %262 = arith.addf %259, %261 : vector<1x128xf32>
    %cst_78 = arith.constant 5.000000e-01 : f32
    %263 = vector.broadcast %cst_78 : f32 to vector<1x128xf32>
    %264 = arith.mulf %263, %262 : vector<1x128xf32>
    %265 = arith.select %5, %262, %264 : vector<1x128xi1>, vector<1x128xf32>
    %266 = math.tanh %265 : vector<1x128xf32>
    %cst_79 = arith.constant 5.000000e-01 : f32
    %267 = vector.broadcast %cst_79 : f32 to vector<1x128xf32>
    %268 = arith.mulf %267, %266 : vector<1x128xf32>
    %cst_80 = arith.constant 5.000000e-01 : f32
    %269 = vector.broadcast %cst_80 : f32 to vector<1x128xf32>
    %270 = arith.addf %268, %269 : vector<1x128xf32>
    %271 = arith.select %5, %266, %270 : vector<1x128xi1>, vector<1x128xf32>
    %272 = vector.extract_strided_slice %271 {offsets = [0, 0], sizes = [1, 32], strides = [1, 1]} : vector<1x128xf32> to vector<1x32xf32>
    %273 = vector.extract_strided_slice %271 {offsets = [0, 32], sizes = [1, 32], strides = [1, 1]} : vector<1x128xf32> to vector<1x32xf32>
    %274 = vector.extract_strided_slice %271 {offsets = [0, 64], sizes = [1, 32], strides = [1, 1]} : vector<1x128xf32> to vector<1x32xf32>
    %275 = vector.extract_strided_slice %271 {offsets = [0, 96], sizes = [1, 32], strides = [1, 1]} : vector<1x128xf32> to vector<1x32xf32>
    %276 = arith.mulf %273, %256 : vector<1x32xf32>
    %277 = arith.mulf %272, %274 : vector<1x32xf32>
    %278 = arith.addf %276, %277 : vector<1x32xf32>
    %279 = math.tanh %278 : vector<1x32xf32>
    %280 = arith.mulf %275, %279 : vector<1x32xf32>
    %281 = vector.extract_strided_slice %212 {offsets = [3, 0], sizes = [1, 128], strides = [1, 1]} : vector<8x128xf32> to vector<1x128xf32>
    %282 = arith.truncf %280 : vector<1x32xf32> to vector<1x32xbf16>
    %cst_81 = arith.constant dense<0.000000e+00> : vector<1x128xf32>
    %283 = tpu.matmul %282, %203, %cst_81 {dimension_numbers = #tpu.dot_dimension_numbers<[1], [0], [0], [1], [0, 0, 1, 1], [], []>} : vector<1x32xbf16>, vector<32x128xbf16>, vector<1x128xf32> -> vector<1x128xf32>
    %284 = arith.addf %281, %283 : vector<1x128xf32>
    %cst_82 = arith.constant 5.000000e-01 : f32
    %285 = vector.broadcast %cst_82 : f32 to vector<1x128xf32>
    %286 = arith.mulf %285, %284 : vector<1x128xf32>
    %287 = arith.select %5, %284, %286 : vector<1x128xi1>, vector<1x128xf32>
    %288 = math.tanh %287 : vector<1x128xf32>
    %cst_83 = arith.constant 5.000000e-01 : f32
    %289 = vector.broadcast %cst_83 : f32 to vector<1x128xf32>
    %290 = arith.mulf %289, %288 : vector<1x128xf32>
    %cst_84 = arith.constant 5.000000e-01 : f32
    %291 = vector.broadcast %cst_84 : f32 to vector<1x128xf32>
    %292 = arith.addf %290, %291 : vector<1x128xf32>
    %293 = arith.select %5, %288, %292 : vector<1x128xi1>, vector<1x128xf32>
    %294 = vector.extract_strided_slice %293 {offsets = [0, 0], sizes = [1, 32], strides = [1, 1]} : vector<1x128xf32> to vector<1x32xf32>
    %295 = vector.extract_strided_slice %293 {offsets = [0, 32], sizes = [1, 32], strides = [1, 1]} : vector<1x128xf32> to vector<1x32xf32>
    %296 = vector.extract_strided_slice %293 {offsets = [0, 64], sizes = [1, 32], strides = [1, 1]} : vector<1x128xf32> to vector<1x32xf32>
    %297 = vector.extract_strided_slice %293 {offsets = [0, 96], sizes = [1, 32], strides = [1, 1]} : vector<1x128xf32> to vector<1x32xf32>
    %298 = arith.mulf %295, %278 : vector<1x32xf32>
    %299 = arith.mulf %294, %296 : vector<1x32xf32>
    %300 = arith.addf %298, %299 : vector<1x32xf32>
    %301 = math.tanh %300 : vector<1x32xf32>
    %302 = arith.mulf %297, %301 : vector<1x32xf32>
    %303 = vector.extract_strided_slice %212 {offsets = [4, 0], sizes = [1, 128], strides = [1, 1]} : vector<8x128xf32> to vector<1x128xf32>
    %304 = arith.truncf %302 : vector<1x32xf32> to vector<1x32xbf16>
    %cst_85 = arith.constant dense<0.000000e+00> : vector<1x128xf32>
    %305 = tpu.matmul %304, %203, %cst_85 {dimension_numbers = #tpu.dot_dimension_numbers<[1], [0], [0], [1], [0, 0, 1, 1], [], []>} : vector<1x32xbf16>, vector<32x128xbf16>, vector<1x128xf32> -> vector<1x128xf32>
    %306 = arith.addf %303, %305 : vector<1x128xf32>
    %cst_86 = arith.constant 5.000000e-01 : f32
    %307 = vector.broadcast %cst_86 : f32 to vector<1x128xf32>
    %308 = arith.mulf %307, %306 : vector<1x128xf32>
    %309 = arith.select %5, %306, %308 : vector<1x128xi1>, vector<1x128xf32>
    %310 = math.tanh %309 : vector<1x128xf32>
    %cst_87 = arith.constant 5.000000e-01 : f32
    %311 = vector.broadcast %cst_87 : f32 to vector<1x128xf32>
    %312 = arith.mulf %311, %310 : vector<1x128xf32>
    %cst_88 = arith.constant 5.000000e-01 : f32
    %313 = vector.broadcast %cst_88 : f32 to vector<1x128xf32>
    %314 = arith.addf %312, %313 : vector<1x128xf32>
    %315 = arith.select %5, %310, %314 : vector<1x128xi1>, vector<1x128xf32>
    %316 = vector.extract_strided_slice %315 {offsets = [0, 0], sizes = [1, 32], strides = [1, 1]} : vector<1x128xf32> to vector<1x32xf32>
    %317 = vector.extract_strided_slice %315 {offsets = [0, 32], sizes = [1, 32], strides = [1, 1]} : vector<1x128xf32> to vector<1x32xf32>
    %318 = vector.extract_strided_slice %315 {offsets = [0, 64], sizes = [1, 32], strides = [1, 1]} : vector<1x128xf32> to vector<1x32xf32>
    %319 = vector.extract_strided_slice %315 {offsets = [0, 96], sizes = [1, 32], strides = [1, 1]} : vector<1x128xf32> to vector<1x32xf32>
    %320 = arith.mulf %317, %300 : vector<1x32xf32>
    %321 = arith.mulf %316, %318 : vector<1x32xf32>
    %322 = arith.addf %320, %321 : vector<1x32xf32>
    %323 = math.tanh %322 : vector<1x32xf32>
    %324 = arith.mulf %319, %323 : vector<1x32xf32>
    %325 = vector.extract_strided_slice %212 {offsets = [5, 0], sizes = [1, 128], strides = [1, 1]} : vector<8x128xf32> to vector<1x128xf32>
    %326 = arith.truncf %324 : vector<1x32xf32> to vector<1x32xbf16>
    %cst_89 = arith.constant dense<0.000000e+00> : vector<1x128xf32>
    %327 = tpu.matmul %326, %203, %cst_89 {dimension_numbers = #tpu.dot_dimension_numbers<[1], [0], [0], [1], [0, 0, 1, 1], [], []>} : vector<1x32xbf16>, vector<32x128xbf16>, vector<1x128xf32> -> vector<1x128xf32>
    %328 = arith.addf %325, %327 : vector<1x128xf32>
    %cst_90 = arith.constant 5.000000e-01 : f32
    %329 = vector.broadcast %cst_90 : f32 to vector<1x128xf32>
    %330 = arith.mulf %329, %328 : vector<1x128xf32>
    %331 = arith.select %5, %328, %330 : vector<1x128xi1>, vector<1x128xf32>
    %332 = math.tanh %331 : vector<1x128xf32>
    %cst_91 = arith.constant 5.000000e-01 : f32
    %333 = vector.broadcast %cst_91 : f32 to vector<1x128xf32>
    %334 = arith.mulf %333, %332 : vector<1x128xf32>
    %cst_92 = arith.constant 5.000000e-01 : f32
    %335 = vector.broadcast %cst_92 : f32 to vector<1x128xf32>
    %336 = arith.addf %334, %335 : vector<1x128xf32>
    %337 = arith.select %5, %332, %336 : vector<1x128xi1>, vector<1x128xf32>
    %338 = vector.extract_strided_slice %337 {offsets = [0, 0], sizes = [1, 32], strides = [1, 1]} : vector<1x128xf32> to vector<1x32xf32>
    %339 = vector.extract_strided_slice %337 {offsets = [0, 32], sizes = [1, 32], strides = [1, 1]} : vector<1x128xf32> to vector<1x32xf32>
    %340 = vector.extract_strided_slice %337 {offsets = [0, 64], sizes = [1, 32], strides = [1, 1]} : vector<1x128xf32> to vector<1x32xf32>
    %341 = vector.extract_strided_slice %337 {offsets = [0, 96], sizes = [1, 32], strides = [1, 1]} : vector<1x128xf32> to vector<1x32xf32>
    %342 = arith.mulf %339, %322 : vector<1x32xf32>
    %343 = arith.mulf %338, %340 : vector<1x32xf32>
    %344 = arith.addf %342, %343 : vector<1x32xf32>
    %345 = math.tanh %344 : vector<1x32xf32>
    %346 = arith.mulf %341, %345 : vector<1x32xf32>
    %347 = vector.extract_strided_slice %212 {offsets = [6, 0], sizes = [1, 128], strides = [1, 1]} : vector<8x128xf32> to vector<1x128xf32>
    %348 = arith.truncf %346 : vector<1x32xf32> to vector<1x32xbf16>
    %cst_93 = arith.constant dense<0.000000e+00> : vector<1x128xf32>
    %349 = tpu.matmul %348, %203, %cst_93 {dimension_numbers = #tpu.dot_dimension_numbers<[1], [0], [0], [1], [0, 0, 1, 1], [], []>} : vector<1x32xbf16>, vector<32x128xbf16>, vector<1x128xf32> -> vector<1x128xf32>
    %350 = arith.addf %347, %349 : vector<1x128xf32>
    %cst_94 = arith.constant 5.000000e-01 : f32
    %351 = vector.broadcast %cst_94 : f32 to vector<1x128xf32>
    %352 = arith.mulf %351, %350 : vector<1x128xf32>
    %353 = arith.select %5, %350, %352 : vector<1x128xi1>, vector<1x128xf32>
    %354 = math.tanh %353 : vector<1x128xf32>
    %cst_95 = arith.constant 5.000000e-01 : f32
    %355 = vector.broadcast %cst_95 : f32 to vector<1x128xf32>
    %356 = arith.mulf %355, %354 : vector<1x128xf32>
    %cst_96 = arith.constant 5.000000e-01 : f32
    %357 = vector.broadcast %cst_96 : f32 to vector<1x128xf32>
    %358 = arith.addf %356, %357 : vector<1x128xf32>
    %359 = arith.select %5, %354, %358 : vector<1x128xi1>, vector<1x128xf32>
    %360 = vector.extract_strided_slice %359 {offsets = [0, 0], sizes = [1, 32], strides = [1, 1]} : vector<1x128xf32> to vector<1x32xf32>
    %361 = vector.extract_strided_slice %359 {offsets = [0, 32], sizes = [1, 32], strides = [1, 1]} : vector<1x128xf32> to vector<1x32xf32>
    %362 = vector.extract_strided_slice %359 {offsets = [0, 64], sizes = [1, 32], strides = [1, 1]} : vector<1x128xf32> to vector<1x32xf32>
    %363 = vector.extract_strided_slice %359 {offsets = [0, 96], sizes = [1, 32], strides = [1, 1]} : vector<1x128xf32> to vector<1x32xf32>
    %364 = arith.mulf %361, %344 : vector<1x32xf32>
    %365 = arith.mulf %360, %362 : vector<1x32xf32>
    %366 = arith.addf %364, %365 : vector<1x32xf32>
    %367 = math.tanh %366 : vector<1x32xf32>
    %368 = arith.mulf %363, %367 : vector<1x32xf32>
    %369 = vector.extract_strided_slice %212 {offsets = [7, 0], sizes = [1, 128], strides = [1, 1]} : vector<8x128xf32> to vector<1x128xf32>
    %370 = arith.truncf %368 : vector<1x32xf32> to vector<1x32xbf16>
    %cst_97 = arith.constant dense<0.000000e+00> : vector<1x128xf32>
    %371 = tpu.matmul %370, %203, %cst_97 {dimension_numbers = #tpu.dot_dimension_numbers<[1], [0], [0], [1], [0, 0, 1, 1], [], []>} : vector<1x32xbf16>, vector<32x128xbf16>, vector<1x128xf32> -> vector<1x128xf32>
    %372 = arith.addf %369, %371 : vector<1x128xf32>
    %cst_98 = arith.constant 5.000000e-01 : f32
    %373 = vector.broadcast %cst_98 : f32 to vector<1x128xf32>
    %374 = arith.mulf %373, %372 : vector<1x128xf32>
    %375 = arith.select %5, %372, %374 : vector<1x128xi1>, vector<1x128xf32>
    %376 = math.tanh %375 : vector<1x128xf32>
    %cst_99 = arith.constant 5.000000e-01 : f32
    %377 = vector.broadcast %cst_99 : f32 to vector<1x128xf32>
    %378 = arith.mulf %377, %376 : vector<1x128xf32>
    %cst_100 = arith.constant 5.000000e-01 : f32
    %379 = vector.broadcast %cst_100 : f32 to vector<1x128xf32>
    %380 = arith.addf %378, %379 : vector<1x128xf32>
    %381 = arith.select %5, %376, %380 : vector<1x128xi1>, vector<1x128xf32>
    %382 = vector.extract_strided_slice %381 {offsets = [0, 0], sizes = [1, 32], strides = [1, 1]} : vector<1x128xf32> to vector<1x32xf32>
    %383 = vector.extract_strided_slice %381 {offsets = [0, 32], sizes = [1, 32], strides = [1, 1]} : vector<1x128xf32> to vector<1x32xf32>
    %384 = vector.extract_strided_slice %381 {offsets = [0, 64], sizes = [1, 32], strides = [1, 1]} : vector<1x128xf32> to vector<1x32xf32>
    %385 = vector.extract_strided_slice %381 {offsets = [0, 96], sizes = [1, 32], strides = [1, 1]} : vector<1x128xf32> to vector<1x32xf32>
    %386 = arith.mulf %383, %366 : vector<1x32xf32>
    %387 = arith.mulf %382, %384 : vector<1x32xf32>
    %388 = arith.addf %386, %387 : vector<1x32xf32>
    %389 = math.tanh %388 : vector<1x32xf32>
    %390 = arith.mulf %385, %389 : vector<1x32xf32>
    %cst_101 = arith.constant 0.000000e+00 : f32
    %391 = vector.broadcast %cst_101 : f32 to vector<1x32xf32>
    %392 = arith.cmpf oge, %390, %391 : vector<1x32xf32>
    %cst_102 = arith.constant 0.00999999977 : f32
    %393 = vector.broadcast %cst_102 : f32 to vector<1x32xf32>
    %394 = arith.mulf %393, %390 : vector<1x32xf32>
    %395 = arith.select %392, %390, %394 : vector<1x32xi1>, vector<1x32xf32>
    %396 = arith.truncf %395 : vector<1x32xf32> to vector<1x32xbf16>
    %c0_103 = arith.constant 0 : index
    %c0_104 = arith.constant 0 : index
    %397 = vector.load %arg4[%c0_103, %c0_104] : memref<32x4xbf16, #tpu.memory_space<vmem>>, vector<32x4xbf16>
    %cst_105 = arith.constant dense<0.000000e+00> : vector<1x4xf32>
    %398 = tpu.matmul %396, %397, %cst_105 {dimension_numbers = #tpu.dot_dimension_numbers<[1], [0], [0], [1], [0, 0, 1, 1], [], []>} : vector<1x32xbf16>, vector<32x4xbf16>, vector<1x4xf32> -> vector<1x4xf32>
    %c0_106 = arith.constant 0 : index
    %c0_107 = arith.constant 0 : index
    %399 = vector.load %arg5[%c0_106, %c0_107] : memref<1x4xf32, #tpu.memory_space<vmem>>, vector<1x4xf32>
    %400 = arith.addf %398, %399 : vector<1x4xf32>
    %cst_108 = arith.constant 0.000000e+00 : f32
    %401 = vector.broadcast %cst_108 : f32 to vector<1x4xf32>
    %402 = arith.maximumf %400, %401 : vector<1x4xf32>
    %c0_109 = arith.constant 0 : index
    %c0_110 = arith.constant 0 : index
    %403 = vector.load %arg6[%c0_109, %c0_110] : memref<1x4xf32, #tpu.memory_space<vmem>>, vector<1x4xf32>
    tpu.vector_store %arg6[%c0_109, %c0_110], %402 {strides = array<i32>} : memref<1x4xf32, #tpu.memory_space<vmem>>, vector<1x4xf32>,
    return
  }
}

</mosaic_0001>

<bundles_post_ra>
// kernel: _lambda_.1
= control target key start
LH: loop header
LB: loop body
LE: loop exit
PB: predicated region body
PF: predicated region fallthrough
CT: control target
= control target key end

     0   :  { %11 = vsyncpa [#allocation4], 0  ;;  %s2405_s0 = inlined_call_operand.vmem [shape: f32[8,16], index: 0, kind: input, shape index: {}]   ;;  %s2406_s1 = inlined_call_operand.hbm [shape: bf16[16,128], index: 1, kind: input, shape index: {}]   ;;  %s2407_s2 = inlined_call_operand.hbm [shape: bf16[2,2,32,128], index: 2, kind: input, shape index: {}]   ;;  %s2408_s3 = inlined_call_operand.vmem [shape: f32[2,1,128], index: 3, kind: input, shape index: {}]   ;;  %s2409_s4 = inlined_call_operand.vmem [shape: bf16[32,4], index: 4, kind: input, shape index: {}]   ;;  %s2410_s5 = inlined_call_operand.vmem [shape: f32[1,4], index: 5, kind: input, shape index: {}]   ;;  %s2411_s6 = inlined_call_operand.hbm [shape: f32[1,4], index: 6, kind: output, shape index: {}]  }
   0x1   :  { %12 = vsyncpa [#allocation7], 0 }
   0x2   :  { %13 = vsyncpa [#allocation5], 0  ;;  %s1981_s21 = smov [#allocation3]   ;;  %s1909_s25 = scalar_lea.hbm %s2406_s1, 128 }
   0x3   :  { %s21_s22 = sshll.u32 %s1981_s21, 4  ;;  %p1910_p0 = scmp.ne.s32.totalorder %s2406_s1, %s1909_s25  ;;  %s22_s22 = int_to_ptr.vmem [resolvable:$true] %s21_s22 }
   0x4   :  { %p1913_p1 = scmp.lt.u32.totalorder %s1909_s25, %s2406_s1 }
   0x6   :  { %p1915_p2 = pnand %p1913_p1, %p1910_p0 }
   0x8   :  { %1918 = shalt.err (!%p1915_p2)
}
   0x9   :  { %s1919_s30 = scalar_lea.vmem %s22_s22, 128  ;;  %p1924_p4 = scmp.lt.s32.totalorder %s22_s22, %s22_s22 }
   0xa   :  { %p1920_p3 = scmp.ne.s32.totalorder %s22_s22, %s1919_s30  ;;  %p1925_p5 = scmp.lt.s32.totalorder %s1919_s30, %s1919_s30 }
   0xc   :  { %p1926_p6 = por %p1925_p5, %p1924_p4 }
   0xe   :  { %p1927_p7 = pnand %p1926_p6, %p1920_p3 }
  0x10   :  { %1930 = shalt.err (!%p1927_p7)
}
  0x11   :  { %s1982_s7 = smov 64   ;;  %s1983_s8 = smov 4  }
  0x12   :  { %27 = dma.hbm_to_vmem [thread:$0]  %s2406_s1, 128, %s22_s22, [#allocation4], %s1982_s7, %s1982_s7, %s1983_s8  }
  0x13   :  { %s1984_s11 = smov [#allocation6]   ;;  %s1931_s15 = scalar_lea.hbm %s2407_s2, 1024 }
  0x14   :  { %s33_s12 = sshll.u32 %s1984_s11, 4  ;;  %p1932_p8 = scmp.ne.s32.totalorder %s2407_s2, %s1931_s15  ;;  %s34_s12 = int_to_ptr.vmem [resolvable:$true] %s33_s12 }
  0x15   :  { %p1935_p9 = scmp.lt.u32.totalorder %s1931_s15, %s2407_s2 }
  0x17   :  { %p1937_p10 = pnand %p1935_p9, %p1932_p8 }
  0x19   :  { %1940 = shalt.err (!%p1937_p10)
}
  0x1a   :  { %s1941_s20 = scalar_lea.vmem %s34_s12, 1024  ;;  %p1946_p12 = scmp.lt.s32.totalorder %s34_s12, %s34_s12 }
  0x1b   :  { %p1942_p11 = scmp.ne.s32.totalorder %s34_s12, %s1941_s20  ;;  %p1947_p13 = scmp.lt.s32.totalorder %s1941_s20, %s1941_s20 }
  0x1d   :  { %p1948_p0 = por %p1947_p13, %p1946_p12 }
  0x1f   :  { %p1949_p1 = pnand %p1948_p0, %p1942_p11 }
  0x21   :  { %1952 = shalt.err (!%p1949_p1)
}
  0x22   :  { %39 = dma.hbm_to_vmem [thread:$0]  %s2407_s2, 1024, %s34_s12, [#allocation7], %s1982_s7, %s1982_s7, %s1983_s8  }
  0x23   :  { %1975 = dma.done.wait [#allocation4], 128  }
  0x24   :  { %1976 = vsyncadd [#allocation4], 4294967168 }
  0x25   :  { %1977 = dma.done.wait [#allocation7], 1024  }
  0x26   :  { %1978 = vsyncadd [#allocation7], 4294966272  ;;  %v1985_v0 = vmov 0.0   ;;  %vm1986_vm0 = vmmov 0   ;;  %v1836_v1 = vld [vmem:[#allocation3] sm:$0xff]   ;;  %v2059_v2 = vld [vmem:[#allocation6 + $0x10] sm:$0xff]   ;;  %v53_v7 = vlaneseq }
  0x27   :  { %1677 = vmatprep.subr.bf16.mxu0 %v1985_v0  ;;  %1683 = vmatprep.subr.bf16.mxu1 %v1985_v0  ;;  %v64_v3 = vld [vmem:[%s2405_s0] sm:$0xff]  ;;  %vm80_vm1 = vcmask 130048   ;;  %v2065_v5 = vld [vmem:[#allocation6 + $0x18] sm:$0xff]   ;;  %v1987_v6 = vmov 0   ;;  %s1988_s24 = smov 32   ;;  %vm136_vm5 = vcmask 261120  }
  0x28   :  { %1679 = vmatprep.mubr.msk.bf16.mxu0 %vm1986_vm0, %v1985_v0  ;;  %1687 = vmatprep.mubr.msk.bf16.mxu1 %vm1986_vm0, %v1985_v0  ;;  %v65_v4 = vpack.c.bf16 %v64_v3, %v64_v3  ;;  %v1592_v8 = vld [vmem:[%s2408_s3] ss:$0 sm:$0xff]  ;;  %v54_v10 = vand.u32 127, %v53_v7  ;;  %vm208_vm6 = vcmask 253952   ;;  %vm376_vm7 = vcmask 256002   ;;  %v1844_v18 = vld [vmem:[%s2409_s4 + $0x8] sm:$0xff]  }
  0x29   :  { %1678 = vmatpush3.bf16.msra.mxu0 %v1836_v1  ;;  %1684 = vmatpush3.bf16.msra.mxu1 %v2059_v2  ;;  %vm546_vm8 = vcmask 258052   ;;  %vm716_vm9 = vcmask 260102   ;;  %vm291_vm10 = vcmask 254977   ;;  %vm460_vm11 = vcmask 257027  }
  0x2a   :  { %1691 = vmatprep.subr.bf16.mxu0 %v1985_v0  ;;  %1685 = vmatprep.subr.bf16.mxu1 %v1985_v0  ;;  %vm55_vm2 = vcmp.ge.s32.totalorder %v54_v10, 64  ;;  %vm56_vm3 = vcmp.lt.s32.totalorder %v54_v10, 96  ;;  %vm630_vm12 = vcmask 259077   ;;  %vm800_vm13 = vcmask 261127  }
  0x2b   :  { %vm2090_vm4 = vmand %vm55_vm2, %vm56_vm3  ;;  %vm1574_vm15 = vcmask 24576  }
  0x2c   :  { %1680 = vmatmul.mubr.msk.bf16.vlgmr.msra.gmra.mrb[0].mxu0 %vm80_vm1, %v65_v4 }
  0x2d   :  { %1692 = vmatpush3.bf16.msra.mxu0 %v2059_v2  ;;  %1695 = vmatprep.mubr.msk.bf16.mxu0 %vm1986_vm0, %v1985_v0 }
  0x2e   :  { %1686 = vmatpush3.bf16.msra.mxu1 %v2065_v5  ;;  %1693 = vmatprep.subr.bf16.mxu0 %v1985_v0 }
  0x2f   :  { %1699 = vmatprep.subr.bf16.mxu1 %v1985_v0 }
  0x31   :  { %1688 = vmatmul.mubr.bf16.vlgmr.msra.gmra.mrb[0].mxu1 %v1987_v6  ;;  %1694 = vmatpush3.bf16.msra.mxu0 %v2065_v5 }
  0x32   :  { %1700 = vmatpush3.bf16.msra.mxu1 %v2059_v2  ;;  %1703 = vmatprep.mubr.msk.bf16.mxu1 %vm1986_vm0, %v1985_v0 }
  0x33   :  { %1701 = vmatprep.subr.bf16.mxu1 %v1985_v0  ;;  %1707 = vmatprep.subr.bf16.mxu0 %v1985_v0 }
  0x36   :  { %1702 = vmatpush3.bf16.msra.mxu1 %v2065_v5 }
  0x37   :  { %1715 = vmatprep.subr.bf16.mxu1 %v1985_v0 }
  0xff   :  { %v118_v9 = vpop.f32.mrb[0].mxu0 }
 0x100   :  { %v1681_v11 = vpop.f32.mrb[1].mxu0  ;;  %v2087_v12 = vadd.f32 %v1592_v8, %v118_v9 }
 0x101   :  { %v121_v13 = vpop.f32.mrb[2].mxu0 }
 0x102   :  { %v1682_v14 = vpop.f32.mrb[3].mxu0 }
 0x104   :  { %v174_v15 = vpop.f32.mrb[0].mxu1 }
 0x105   :  { %v180_v16 = vadd.f32 %v174_v15, %v2087_v12  ;;  %v1689_v17 = vpop.f32.mrb[1].mxu1 }
 0x106   :  { %v177_v19 = vpop.f32.mrb[2].mxu1 }
 0x107   :  { %v181_v20 = vmul.f32 0.5, %v180_v16  ;;  %v1690_v21 = vpop.f32.mrb[3].mxu1 }
 0x109   :  { %v182_v22 = vsel %vm2090_vm4, %v180_v16, %v181_v20 }
 0x10a   :  { %1845 = vtanh.f32 %v182_v22 }
 0x114   :  { %v1846_v23 = vpop.eup %1845 }
 0x115   :  { %v184_v24 = vmul.f32 0.5, %v1846_v23 }
 0x117   :  { %v185_v25 = vadd.f32 0.5, %v184_v24 }
 0x119   :  { %v186_v26 = vsel %vm2090_vm4, %v1846_v23, %v185_v25 }
 0x11a   :  { %189 = vrot.lane.b32.xlu0 %v186_v26, %s1982_s7  ;;  %v187_v29 = vmul.f32 0.0, %v186_v26 }
 0x18c   :  { %v190_v27 = vpop.permute.xlu0 %189 }
 0x18d   :  { %v192_v28 = vmul.f32 %v190_v27, %v186_v26 }
 0x18f   :  { %194 = vrot.lane.b32.xlu0 %v192_v28, %s1988_s24 }
 0x201   :  { %v195_v30 = vpop.permute.xlu0 %194 }
 0x202   :  { %v197_v31 = vadd.f32 %v195_v30, %v187_v29 }
 0x204   :  { %1847 = vtanh.f32 %v197_v31  ;;  %v268_v51 = vrot.slane %v197_v31, 7 }
 0x20e   :  { %v1848_v32 = vpop.eup %1847 }
 0x20f   :  { %200 = vrot.lane.b32.xlu1 %v1848_v32, %s1982_s7 }
 0x281   :  { %v201_v33 = vpop.permute.xlu1 %200 }
 0x282   :  { %v2101_v34 = vmul.f32 %v201_v33, %v186_v26 }
 0x284   :  { %v210_v35 = vpack.c.bf16 %v2101_v34, %v2101_v34 }
 0x286   :  { %212 = vrot.lane.b32.xlu1 %v210_v35, %s1988_s24 }
 0x2f8   :  { %v213_v36 = vpop.permute.xlu1 %212 }
 0x2f9   :  { %1696 = vmatmul.mubr.msk.bf16.vlgmr.msra.gmra.mrb[4].mxu0 %vm136_vm5, %v213_v36 }
 0x2fa   :  { %1708 = vmatpush3.bf16.msra.mxu0 %v2059_v2  ;;  %1711 = vmatprep.mubr.msk.bf16.mxu0 %vm1986_vm0, %v1985_v0 }
 0x2fb   :  { %1709 = vmatprep.subr.bf16.mxu0 %v1985_v0 }
 0x2fe   :  { %1710 = vmatpush3.bf16.msra.mxu0 %v2065_v5 }
 0x2ff   :  { %1723 = vmatprep.subr.bf16.mxu0 %v1985_v0 }
 0x3cc   :  { %v251_v37 = vpop.f32.mrb[4].mxu0 }
 0x3cd   :  { %v258_v38 = vrot.slane %v251_v37, 7  ;;  %v1697_v39 = vpop.f32.mrb[5].mxu0 }
 0x3ce   :  { %v254_v40 = vpop.f32.mrb[6].mxu0 }
 0x3cf   :  { %v260_v41 = vadd.f32 %v258_v38, %v2087_v12  ;;  %v1698_v42 = vpop.f32.mrb[7].mxu0 }
 0x3d1   :  { %v261_v43 = vmul.f32 0.5, %v260_v41 }
 0x3d3   :  { %v262_v44 = vsel %vm2090_vm4, %v260_v41, %v261_v43 }
 0x3d4   :  { %1849 = vtanh.f32 %v262_v44 }
 0x3de   :  { %v1850_v45 = vpop.eup %1849 }
 0x3df   :  { %v264_v46 = vmul.f32 0.5, %v1850_v45 }
 0x3e1   :  { %v265_v47 = vadd.f32 0.5, %v264_v46 }
 0x3e3   :  { %v266_v48 = vsel %vm2090_vm4, %v1850_v45, %v265_v47 }
 0x3e4   :  { %272 = vrot.lane.b32.xlu0 %v266_v48, %s1982_s7  ;;  %v270_v52 = vmul.f32 %v268_v51, %v266_v48 }
 0x456   :  { %v273_v49 = vpop.permute.xlu0 %272 }
 0x457   :  { %v275_v50 = vmul.f32 %v273_v49, %v266_v48 }
 0x459   :  { %277 = vrot.lane.b32.xlu1 %v275_v50, %s1988_s24 }
 0x4cb   :  { %v278_v53 = vpop.permute.xlu1 %277 }
 0x4cc   :  { %v280_v54 = vadd.f32 %v278_v53, %v270_v52 }
 0x4ce   :  { %1851 = vtanh.f32 %v280_v54  ;;  %v353_v16 = vrot.slane %v280_v54, 7 }
 0x4d8   :  { %v1852_v55 = vpop.eup %1851 }
 0x4d9   :  { %283 = vrot.lane.b32.xlu0 %v1852_v55, %s1982_s7 }
 0x54b   :  { %v284_v56 = vpop.permute.xlu0 %283 }
 0x54c   :  { %v2121_v57 = vmul.f32 %v284_v56, %v266_v48 }
 0x54e   :  { %v293_v58 = vpack.c.bf16 %v2121_v57, %v2121_v57 }
 0x550   :  { %v295_v59 = vshrl.u32 %v293_v58, 16 }
 0x552   :  { %297 = vrot.lane.b32.xlu1 %v295_v59, %s1988_s24 }
 0x5c4   :  { %v298_v60 = vpop.permute.xlu1 %297 }
 0x5c5   :  { %1704 = vmatmul.mubr.msk.bf16.vlgmr.msra.gmra.mrb[4].mxu1 %vm136_vm5, %v298_v60 }
 0x5c6   :  { %1716 = vmatpush3.bf16.msra.mxu1 %v2059_v2  ;;  %1719 = vmatprep.mubr.msk.bf16.mxu1 %vm1986_vm0, %v1985_v0 }
 0x5c7   :  { %1717 = vmatprep.subr.bf16.mxu1 %v1985_v0 }
 0x5ca   :  { %1718 = vmatpush3.bf16.msra.mxu1 %v2065_v5 }
 0x5cb   :  { %1731 = vmatprep.subr.bf16.mxu1 %v1985_v0 }
 0x698   :  { %v336_v61 = vpop.f32.mrb[4].mxu1 }
 0x699   :  { %v343_v62 = vrot.slane %v336_v61, 6  ;;  %v1705_v63 = vpop.f32.mrb[5].mxu1 }
 0x69a   :  { %v339_v1 = vpop.f32.mrb[6].mxu1 }
 0x69b   :  { %v345_v3 = vadd.f32 %v343_v62, %v2087_v12  ;;  %v1706_v4 = vpop.f32.mrb[7].mxu1 }
 0x69d   :  { %v346_v7 = vmul.f32 0.5, %v345_v3 }
 0x69f   :  { %v347_v8 = vsel %vm2090_vm4, %v345_v3, %v346_v7 }
 0x6a0   :  { %1853 = vtanh.f32 %v347_v8 }
 0x6aa   :  { %v1854_v9 = vpop.eup %1853 }
 0x6ab   :  { %v349_v10 = vmul.f32 0.5, %v1854_v9 }
 0x6ad   :  { %v350_v11 = vadd.f32 0.5, %v349_v10 }
 0x6af   :  { %v351_v13 = vsel %vm2090_vm4, %v1854_v9, %v350_v11 }
 0x6b0   :  { %357 = vrot.lane.b32.xlu0 %v351_v13, %s1982_s7  ;;  %v355_v17 = vmul.f32 %v353_v16, %v351_v13 }
 0x722   :  { %v358_v14 = vpop.permute.xlu0 %357 }
 0x723   :  { %v360_v15 = vmul.f32 %v358_v14, %v351_v13 }
 0x725   :  { %362 = vrot.lane.b32.xlu1 %v360_v15, %s1988_s24 }
 0x797   :  { %v363_v19 = vpop.permute.xlu1 %362 }
 0x798   :  { %v365_v20 = vadd.f32 %v363_v19, %v355_v17 }
 0x79a   :  { %1855 = vtanh.f32 %v365_v20  ;;  %v437_v42 = vrot.slane %v365_v20, 7 }
 0x7a4   :  { %v1856_v21 = vpop.eup %1855 }
 0x7a5   :  { %368 = vrot.lane.b32.xlu0 %v1856_v21, %s1982_s7 }
 0x817   :  { %v369_v22 = vpop.permute.xlu0 %368 }
 0x818   :  { %v2141_v23 = vmul.f32 %v369_v22, %v351_v13 }
 0x81a   :  { %v378_v24 = vpack.c.bf16 %v2141_v23, %v2141_v23 }
 0x81c   :  { %v380_v25 = vrot.slane %v378_v24, 1 }
 0x81e   :  { %381 = vrot.lane.b32.xlu1 %v380_v25, %s1988_s24 }
 0x890   :  { %v382_v26 = vpop.permute.xlu1 %381 }
 0x891   :  { %1712 = vmatmul.mubr.msk.bf16.vlgmr.msra.gmra.mrb[8].mxu0 %vm136_vm5, %v382_v26 }
 0x892   :  { %1724 = vmatpush3.bf16.msra.mxu0 %v2059_v2  ;;  %1727 = vmatprep.mubr.msk.bf16.mxu0 %vm1986_vm0, %v1985_v0 }
 0x893   :  { %1725 = vmatprep.subr.bf16.mxu0 %v1985_v0 }
 0x896   :  { %1726 = vmatpush3.bf16.msra.mxu0 %v2065_v5 }
 0x897   :  { %1739 = vmatprep.subr.bf16.mxu0 %v1985_v0 }
 0x964   :  { %v420_v27 = vpop.f32.mrb[8].mxu0 }
 0x965   :  { %v427_v28 = vrot.slane %v420_v27, 5  ;;  %v1713_v29 = vpop.f32.mrb[9].mxu0 }
 0x966   :  { %v423_v30 = vpop.f32.mrb[10].mxu0 }
 0x967   :  { %v429_v31 = vadd.f32 %v427_v28, %v2087_v12  ;;  %v1714_v32 = vpop.f32.mrb[11].mxu0 }
 0x969   :  { %v430_v33 = vmul.f32 0.5, %v429_v31 }
 0x96b   :  { %v431_v35 = vsel %vm2090_vm4, %v429_v31, %v430_v33 }
 0x96c   :  { %1857 = vtanh.f32 %v431_v35 }
 0x976   :  { %v1858_v36 = vpop.eup %1857 }
 0x977   :  { %v433_v37 = vmul.f32 0.5, %v1858_v36 }
 0x979   :  { %v434_v38 = vadd.f32 0.5, %v433_v37 }
 0x97b   :  { %v435_v39 = vsel %vm2090_vm4, %v1858_v36, %v434_v38 }
 0x97c   :  { %441 = vrot.lane.b32.xlu0 %v435_v39, %s1982_s7  ;;  %v439_v43 = vmul.f32 %v437_v42, %v435_v39 }
 0x9ee   :  { %v442_v40 = vpop.permute.xlu0 %441 }
 0x9ef   :  { %v444_v41 = vmul.f32 %v442_v40, %v435_v39 }
 0x9f1   :  { %446 = vrot.lane.b32.xlu1 %v444_v41, %s1988_s24 }
 0xa63   :  { %v447_v44 = vpop.permute.xlu1 %446 }
 0xa64   :  { %v449_v45 = vadd.f32 %v447_v44, %v439_v43 }
 0xa66   :  { %1859 = vtanh.f32 %v449_v45  ;;  %v523_v8 = vrot.slane %v449_v45, 7 }
 0xa70   :  { %v1860_v46 = vpop.eup %1859 }
 0xa71   :  { %452 = vrot.lane.b32.xlu0 %v1860_v46, %s1982_s7 }
 0xae3   :  { %v453_v47 = vpop.permute.xlu0 %452 }
 0xae4   :  { %v2161_v48 = vmul.f32 %v453_v47, %v435_v39 }
 0xae6   :  { %v462_v49 = vpack.c.bf16 %v2161_v48, %v2161_v48 }
 0xae8   :  { %v464_v50 = vshrl.u32 %v462_v49, 16 }
 0xaea   :  { %v466_v51 = vrot.slane %v464_v50, 1 }
 0xaec   :  { %467 = vrot.lane.b32.xlu1 %v466_v51, %s1988_s24 }
 0xb5e   :  { %v468_v52 = vpop.permute.xlu1 %467 }
 0xb5f   :  { %1720 = vmatmul.mubr.msk.bf16.vlgmr.msra.gmra.mrb[8].mxu1 %vm136_vm5, %v468_v52 }
 0xb60   :  { %1732 = vmatpush3.bf16.msra.mxu1 %v2059_v2  ;;  %1735 = vmatprep.mubr.msk.bf16.mxu1 %vm1986_vm0, %v1985_v0 }
 0xb61   :  { %1733 = vmatprep.subr.bf16.mxu1 %v1985_v0 }
 0xb64   :  { %1734 = vmatpush3.bf16.msra.mxu1 %v2065_v5 }
 0xb65   :  { %1747 = vmatprep.subr.bf16.mxu1 %v1985_v0 }
 0xc32   :  { %v506_v53 = vpop.f32.mrb[8].mxu1 }
 0xc33   :  { %v513_v54 = vrot.slane %v506_v53, 4  ;;  %v1721_v55 = vpop.f32.mrb[9].mxu1 }
 0xc34   :  { %v509_v56 = vpop.f32.mrb[10].mxu1 }
 0xc35   :  { %v515_v58 = vadd.f32 %v513_v54, %v2087_v12  ;;  %v1722_v59 = vpop.f32.mrb[11].mxu1 }
 0xc37   :  { %v516_v60 = vmul.f32 0.5, %v515_v58 }
 0xc39   :  { %v517_v61 = vsel %vm2090_vm4, %v515_v58, %v516_v60 }
 0xc3a   :  { %1861 = vtanh.f32 %v517_v61 }
 0xc44   :  { %v1862_v62 = vpop.eup %1861 }
 0xc45   :  { %v519_v63 = vmul.f32 0.5, %v1862_v62 }
 0xc47   :  { %v520_v1 = vadd.f32 0.5, %v519_v63 }
 0xc49   :  { %v521_v3 = vsel %vm2090_vm4, %v1862_v62, %v520_v1 }
 0xc4a   :  { %527 = vrot.lane.b32.xlu0 %v521_v3, %s1982_s7  ;;  %v525_v9 = vmul.f32 %v523_v8, %v521_v3 }
 0xcbc   :  { %v528_v4 = vpop.permute.xlu0 %527 }
 0xcbd   :  { %v530_v7 = vmul.f32 %v528_v4, %v521_v3 }
 0xcbf   :  { %532 = vrot.lane.b32.xlu1 %v530_v7, %s1988_s24 }
 0xd31   :  { %v533_v10 = vpop.permute.xlu1 %532 }
 0xd32   :  { %v535_v11 = vadd.f32 %v533_v10, %v525_v9 }
 0xd34   :  { %1863 = vtanh.f32 %v535_v11  ;;  %v607_v33 = vrot.slane %v535_v11, 7 }
 0xd3e   :  { %v1864_v13 = vpop.eup %1863 }
 0xd3f   :  { %538 = vrot.lane.b32.xlu0 %v1864_v13, %s1982_s7 }
 0xdb1   :  { %v539_v14 = vpop.permute.xlu0 %538 }
 0xdb2   :  { %v2181_v15 = vmul.f32 %v539_v14, %v521_v3 }
 0xdb4   :  { %v548_v16 = vpack.c.bf16 %v2181_v15, %v2181_v15 }
 0xdb6   :  { %v550_v17 = vrot.slane %v548_v16, 2 }
 0xdb8   :  { %551 = vrot.lane.b32.xlu1 %v550_v17, %s1988_s24 }
 0xe2a   :  { %v552_v19 = vpop.permute.xlu1 %551 }
 0xe2b   :  { %1728 = vmatmul.mubr.msk.bf16.vlgmr.msra.gmra.mrb[12].mxu0 %vm136_vm5, %v552_v19 }
 0xe2c   :  { %1740 = vmatpush3.bf16.msra.mxu0 %v2059_v2  ;;  %1743 = vmatprep.mubr.msk.bf16.mxu0 %vm1986_vm0, %v1985_v0 }
 0xe2d   :  { %1741 = vmatprep.subr.bf16.mxu0 %v1985_v0 }
 0xe30   :  { %1742 = vmatpush3.bf16.msra.mxu0 %v2065_v5 }
 0xe31   :  { %1755 = vmatprep.subr.bf16.mxu0 %v1985_v0 }
 0xefe   :  { %v590_v20 = vpop.f32.mrb[12].mxu0 }
 0xeff   :  { %v597_v21 = vrot.slane %v590_v20, 3  ;;  %v1729_v22 = vpop.f32.mrb[13].mxu0 }
 0xf00   :  { %v593_v24 = vpop.f32.mrb[14].mxu0 }
 0xf01   :  { %v599_v25 = vadd.f32 %v597_v21, %v2087_v12  ;;  %v1730_v26 = vpop.f32.mrb[15].mxu0 }
 0xf03   :  { %v600_v27 = vmul.f32 0.5, %v599_v25 }
 0xf05   :  { %v601_v2 = vsel %vm2090_vm4, %v599_v25, %v600_v27 }
 0xf06   :  { %1865 = vtanh.f32 %v601_v2 }
 0xf10   :  { %v1866_v28 = vpop.eup %1865 }
 0xf11   :  { %v603_v29 = vmul.f32 0.5, %v1866_v28 }
 0xf13   :  { %v604_v30 = vadd.f32 0.5, %v603_v29 }
 0xf15   :  { %v605_v5 = vsel %vm2090_vm4, %v1866_v28, %v604_v30 }
 0xf16   :  { %611 = vrot.lane.b32.xlu0 %v605_v5, %s1982_s7  ;;  %v609_v35 = vmul.f32 %v607_v33, %v605_v5  ;;  %v2242_v33 = vld [vmem:[#allocation6 + $0x30] sm:$0xff]  }
 0xf88   :  { %v612_v31 = vpop.permute.xlu0 %611 }
 0xf89   :  { %v614_v32 = vmul.f32 %v612_v31, %v605_v5 }
 0xf8b   :  { %616 = vrot.lane.b32.xlu1 %v614_v32, %s1988_s24 }
 0xffd   :  { %v617_v36 = vpop.permute.xlu1 %616 }
 0xffe   :  { %v619_v37 = vadd.f32 %v617_v36, %v609_v35  ;;  %v1841_v35 = vld [vmem:[#allocation6 + $0x28] sm:$0xff]   ;;  %v2245_v36 = vld [vmem:[#allocation6 + $0x38] sm:$0xff]  }
0x1000   :  { %1867 = vtanh.f32 %v619_v37  ;;  %v693_v61 = vrot.slane %v619_v37, 7 }
0x100a   :  { %v1868_v38 = vpop.eup %1867 }
0x100b   :  { %622 = vrot.lane.b32.xlu0 %v1868_v38, %s1982_s7 }
0x107d   :  { %v623_v39 = vpop.permute.xlu0 %622 }
0x107e   :  { %v2201_v40 = vmul.f32 %v623_v39, %v605_v5 }
0x1080   :  { %v632_v41 = vpack.c.bf16 %v2201_v40, %v2201_v40 }
0x1082   :  { %v634_v42 = vshrl.u32 %v632_v41, 16 }
0x1084   :  { %v636_v43 = vrot.slane %v634_v42, 2 }
0x1086   :  { %637 = vrot.lane.b32.xlu1 %v636_v43, %s1988_s24 }
0x10f8   :  { %v638_v44 = vpop.permute.xlu1 %637 }
0x10f9   :  { %1736 = vmatmul.mubr.msk.bf16.vlgmr.msra.gmra.mrb[12].mxu1 %vm136_vm5, %v638_v44 }
0x10fa   :  { %1751 = vmatprep.mubr.msk.bf16.mxu1 %vm1986_vm0, %v1985_v0 }
0x11cc   :  { %v676_v45 = vpop.f32.mrb[12].mxu1 }
0x11cd   :  { %v683_v46 = vrot.slane %v676_v45, 2  ;;  %v1737_v47 = vpop.f32.mrb[13].mxu1 }
0x11ce   :  { %v679_v49 = vpop.f32.mrb[14].mxu1 }
0x11cf   :  { %v685_v50 = vadd.f32 %v683_v46, %v2087_v12  ;;  %v1738_v51 = vpop.f32.mrb[15].mxu1  ;;  %v1605_v46 = vld [vmem:[%s2408_s3 + $0x1] ss:$0 sm:$0xff] }
0x11d1   :  { %v686_v52 = vmul.f32 0.5, %v685_v50 }
0x11d3   :  { %v687_v53 = vsel %vm2090_vm4, %v685_v50, %v686_v52 }
0x11d4   :  { %1869 = vtanh.f32 %v687_v53 }
0x11de   :  { %v1870_v54 = vpop.eup %1869 }
0x11df   :  { %v689_v55 = vmul.f32 0.5, %v1870_v54 }
0x11e1   :  { %v690_v56 = vadd.f32 0.5, %v689_v55 }
0x11e3   :  { %v691_v58 = vsel %vm2090_vm4, %v1870_v54, %v690_v56 }
0x11e4   :  { %697 = vrot.lane.b32.xlu0 %v691_v58, %s1982_s7  ;;  %v695_v62 = vmul.f32 %v693_v61, %v691_v58 }
0x1256   :  { %v698_v59 = vpop.permute.xlu0 %697 }
0x1257   :  { %v700_v60 = vmul.f32 %v698_v59, %v691_v58 }
0x1259   :  { %702 = vrot.lane.b32.xlu1 %v700_v60, %s1988_s24 }
0x12cb   :  { %v703_v63 = vpop.permute.xlu1 %702 }
0x12cc   :  { %v705_v1 = vadd.f32 %v703_v63, %v695_v62 }
0x12ce   :  { %1871 = vtanh.f32 %v705_v1 }
0x12d8   :  { %v1872_v3 = vpop.eup %1871 }
0x12d9   :  { %708 = vrot.lane.b32.xlu0 %v1872_v3, %s1982_s7 }
0x134b   :  { %v709_v4 = vpop.permute.xlu0 %708 }
0x134c   :  { %v711_v7 = vmul.f32 %v709_v4, %v691_v58 }
0x134e   :  { %v718_v8 = vpack.c.bf16 %v711_v7, %v711_v7 }
0x1350   :  { %v720_v9 = vrot.slane %v718_v8, 3 }
0x1352   :  { %721 = vrot.lane.b32.xlu1 %v720_v9, %s1988_s24 }
0x13c4   :  { %v722_v10 = vpop.permute.xlu1 %721 }
0x13c5   :  { %1744 = vmatmul.mubr.msk.bf16.vlgmr.msra.gmra.mrb[16].mxu0 %vm136_vm5, %v722_v10 }
0x13c6   :  { %1759 = vmatprep.mubr.msk.bf16.mxu0 %vm1986_vm0, %v1985_v0  ;;  %1756 = vmatpush3.bf16.msra.mxu0 %v2242_v33 }
0x13c7   :  { %1757 = vmatprep.subr.bf16.mxu0 %v1985_v0 }
0x13ca   :  { %1758 = vmatpush3.bf16.msra.mxu0 %v2245_v36 }
0x13cb   :  { %1771 = vmatprep.subr.bf16.mxu0 %v1985_v0 }
0x13cd   :  { %1760 = vmatmul.mubr.bf16.vlgmr.msra.gmra.mrb[20].mxu0 %v1987_v6 }
0x13ce   :  { %1772 = vmatpush3.bf16.msra.mxu0 %v2242_v33  ;;  %1775 = vmatprep.mubr.msk.bf16.mxu0 %vm1986_vm0, %v1985_v0 }
0x13cf   :  { %1773 = vmatprep.subr.bf16.mxu0 %v1985_v0 }
0x13d2   :  { %1774 = vmatpush3.bf16.msra.mxu0 %v2245_v36 }
0x13d3   :  { %1787 = vmatprep.subr.bf16.mxu0 %v1985_v0 }
0x1498   :  { %v760_v11 = vpop.f32.mrb[16].mxu0 }
0x1499   :  { %v767_v13 = vrot.slane %v760_v11, 1  ;;  %v1745_v14 = vpop.f32.mrb[17].mxu0 }
0x149a   :  { %v763_v16 = vpop.f32.mrb[18].mxu0 }
0x149b   :  { %v769_v17 = vadd.f32 %v767_v13, %v2087_v12  ;;  %v1746_v19 = vpop.f32.mrb[19].mxu0  ;;  %v777_v12 = vrot.slane %v705_v1, 7 }
0x149d   :  { %v770_v20 = vmul.f32 0.5, %v769_v17 }
0x149f   :  { %v771_v21 = vsel %vm2090_vm4, %v769_v17, %v770_v20 }
0x14a0   :  { %1873 = vtanh.f32 %v771_v21  ;;  %v923_v42 = vpop.f32.mrb[20].mxu0 }
0x14a1   :  { %v1761_v43 = vpop.f32.mrb[21].mxu0 }
0x14a2   :  { %v926_v44 = vpop.f32.mrb[22].mxu0 }
0x14a3   :  { %v1762_v45 = vpop.f32.mrb[23].mxu0 }
0x14aa   :  { %v1874_v22 = vpop.eup %1873 }
0x14ab   :  { %v773_v24 = vmul.f32 0.5, %v1874_v22 }
0x14ad   :  { %v774_v25 = vadd.f32 0.5, %v773_v24 }
0x14af   :  { %v775_v26 = vsel %vm2090_vm4, %v1874_v22, %v774_v25 }
0x14b0   :  { %781 = vrot.lane.b32.xlu0 %v775_v26, %s1982_s7  ;;  %v779_v28 = vmul.f32 %v777_v12, %v775_v26 }
0x1522   :  { %v782_v27 = vpop.permute.xlu0 %781 }
0x1523   :  { %v784_v2 = vmul.f32 %v782_v27, %v775_v26 }
0x1525   :  { %786 = vrot.lane.b32.xlu1 %v784_v2, %s1988_s24 }
0x1529   :  { %205 = vrot.lane.b32.xlu1 %v2101_v34, %s1988_s24 }
0x152d   :  { %373 = vrot.lane.b32.xlu1 %v2141_v23, %s1988_s24 }
0x1531   :  { %543 = vrot.lane.b32.xlu1 %v2181_v15, %s1988_s24  ;;  %v1839_v15 = vld [vmem:[#allocation6 + $0x20] sm:$0xff]  }
0x1532   :  { %1748 = vmatpush3.bf16.msra.mxu1 %v1839_v15 }
0x1533   :  { %1749 = vmatprep.subr.bf16.mxu1 %v1985_v0 }
0x1535   :  { %713 = vrot.lane.b32.xlu1 %v711_v7, %s1988_s24 }
0x1536   :  { %1750 = vmatpush3.bf16.msra.mxu1 %v1841_v35 }
0x1537   :  { %1763 = vmatprep.subr.bf16.mxu1 %v1985_v0 }
0x1597   :  { %v787_v29 = vpop.permute.xlu1 %786 }
0x1598   :  { %v789_v30 = vadd.f32 %v787_v29, %v779_v28 }
0x159a   :  { %1875 = vtanh.f32 %v789_v30 }
0x159b   :  { %v206_v5 = vpop.permute.xlu1 %205 }
0x159c   :  { %209 = vst.msk [vmem:[#allocation2] sm:$0x1] %vm208_vm6, %v206_v5 }
0x159f   :  { %v374_v31 = vpop.permute.xlu1 %373 }
0x15a0   :  { %377 = vst.msk [vmem:[#allocation2] sm:$0x4] %vm376_vm7, %v374_v31 }
0x15a3   :  { %v544_v34 = vpop.permute.xlu1 %543 }
0x15a4   :  { %v1876_v32 = vpop.eup %1875  ;;  %547 = vst.msk [vmem:[#allocation2] sm:$0x10] %vm546_vm8, %v544_v34 }
0x15a5   :  { %792 = vrot.lane.b32.xlu0 %v1876_v32, %s1982_s7 }
0x15a7   :  { %v714_v23 = vpop.permute.xlu1 %713 }
0x15a8   :  { %717 = vst.msk [vmem:[#allocation2] sm:$0x40] %vm716_vm9, %v714_v23 }
0x15a9   :  { %288 = vrot.lane.b32.xlu0 %v2121_v57, %s1988_s24 }
0x15ad   :  { %457 = vrot.lane.b32.xlu0 %v2161_v48, %s1988_s24 }
0x15b1   :  { %627 = vrot.lane.b32.xlu0 %v2201_v40, %s1988_s24 }
0x1617   :  { %v793_v57 = vpop.permute.xlu0 %792 }
0x1618   :  { %v795_v48 = vmul.f32 %v793_v57, %v775_v26 }
0x161a   :  { %797 = vrot.lane.b32.xlu0 %v795_v48, %s1988_s24 }
0x161b   :  { %v289_v37 = vpop.permute.xlu0 %288 }
0x161c   :  { %292 = vst.msk [vmem:[#allocation2] sm:$0x2] %vm291_vm10, %v289_v37 }
0x161f   :  { %v458_v6 = vpop.permute.xlu0 %457 }
0x1620   :  { %461 = vst.msk [vmem:[#allocation2] sm:$0x8] %vm460_vm11, %v458_v6 }
0x1623   :  { %v628_v38 = vpop.permute.xlu0 %627 }
0x1624   :  { %631 = vst.msk [vmem:[#allocation2] sm:$0x20] %vm630_vm12, %v628_v38 }
0x168c   :  { %v798_v39 = vpop.permute.xlu0 %797 }
0x168d   :  { %801 = vst.msk [vmem:[#allocation2] sm:$0x80] %vm800_vm13, %v798_v39 }
0x1694   :  { %v809_v40 = vld [vmem:[#allocation2] sm:$0xff] }
0x1695   :  { %v810_v41 = vpack.c.bf16 %v809_v40, %v809_v40 }
0x1697   :  { %1752 = vmatmul.mubr.msk.bf16.vlgmr.msra.gmra.mrb[16].mxu1 %vm136_vm5, %v810_v41 }
0x1698   :  { %1764 = vmatpush3.bf16.msra.mxu1 %v2242_v33  ;;  %1767 = vmatprep.mubr.msk.bf16.mxu1 %vm1986_vm0, %v1985_v0 }
0x1699   :  { %1765 = vmatprep.subr.bf16.mxu1 %v1985_v0 }
0x169c   :  { %1766 = vmatpush3.bf16.msra.mxu1 %v2245_v36 }
0x169d   :  { %1779 = vmatprep.subr.bf16.mxu1 %v1985_v0 }
0x176a   :  { %v871_v47 = vpop.f32.mrb[16].mxu1 }
0x176b   :  { %v2270_v49 = vadd.f32 %v1605_v46, %v871_v47  ;;  %v1753_v50 = vpop.f32.mrb[17].mxu1 }
0x176c   :  { %v874_v51 = vpop.f32.mrb[18].mxu1 }
0x176d   :  { %v1754_v52 = vpop.f32.mrb[19].mxu1  ;;  %v929_v53 = vadd.f32 %v923_v42, %v2270_v49 }
0x176f   :  { %v930_v54 = vmul.f32 0.5, %v929_v53 }
0x1771   :  { %v931_v55 = vsel %vm2090_vm4, %v929_v53, %v930_v54 }
0x1772   :  { %1877 = vtanh.f32 %v931_v55 }
0x177c   :  { %v1878_v56 = vpop.eup %1877 }
0x177d   :  { %v933_v58 = vmul.f32 0.5, %v1878_v56 }
0x177f   :  { %v934_v59 = vadd.f32 0.5, %v933_v58 }
0x1781   :  { %v935_v60 = vsel %vm2090_vm4, %v1878_v56, %v934_v59 }
0x1782   :  { %938 = vrot.lane.b32.xlu1 %v935_v60, %s1982_s7  ;;  %v936_v63 = vmul.f32 0.0, %v935_v60 }
0x17f4   :  { %v939_v61 = vpop.permute.xlu1 %938 }
0x17f5   :  { %v941_v62 = vmul.f32 %v939_v61, %v935_v60 }
0x17f7   :  { %943 = vrot.lane.b32.xlu0 %v941_v62, %s1988_s24 }
0x1869   :  { %v944_v1 = vpop.permute.xlu0 %943 }
0x186a   :  { %v946_v3 = vadd.f32 %v944_v1, %v936_v63 }
0x186c   :  { %1879 = vtanh.f32 %v946_v3  ;;  %v1011_v12 = vrot.slane %v946_v3, 7 }
0x1876   :  { %v1880_v4 = vpop.eup %1879 }
0x1877   :  { %949 = vrot.lane.b32.xlu1 %v1880_v4, %s1982_s7 }
0x18e9   :  { %v950_v7 = vpop.permute.xlu1 %949 }
0x18ea   :  { %v952_v8 = vmul.f32 %v950_v7, %v935_v60 }
0x18ec   :  { %v953_v9 = vpack.c.bf16 %v952_v8, %v952_v8 }
0x18ee   :  { %955 = vrot.lane.b32.xlu0 %v953_v9, %s1988_s24 }
0x1960   :  { %v956_v10 = vpop.permute.xlu0 %955 }
0x1961   :  { %1768 = vmatmul.mubr.msk.bf16.vlgmr.msra.gmra.mrb[20].mxu1 %vm136_vm5, %v956_v10 }
0x1962   :  { %1780 = vmatpush3.bf16.msra.mxu1 %v2242_v33  ;;  %1783 = vmatprep.mubr.msk.bf16.mxu1 %vm1986_vm0, %v1985_v0 }
0x1963   :  { %1781 = vmatprep.subr.bf16.mxu1 %v1985_v0 }
0x1966   :  { %1782 = vmatpush3.bf16.msra.mxu1 %v2245_v36 }
0x1967   :  { %1795 = vmatprep.subr.bf16.mxu1 %v1985_v0 }
0x1a34   :  { %v994_v11 = vpop.f32.mrb[20].mxu1 }
0x1a35   :  { %v1001_v13 = vrot.slane %v994_v11, 7  ;;  %v1769_v14 = vpop.f32.mrb[21].mxu1 }
0x1a36   :  { %v997_v16 = vpop.f32.mrb[22].mxu1 }
0x1a37   :  { %v1003_v17 = vadd.f32 %v1001_v13, %v2270_v49  ;;  %v1770_v19 = vpop.f32.mrb[23].mxu1 }
0x1a39   :  { %v1004_v20 = vmul.f32 0.5, %v1003_v17 }
0x1a3b   :  { %v1005_v21 = vsel %vm2090_vm4, %v1003_v17, %v1004_v20 }
0x1a3c   :  { %1881 = vtanh.f32 %v1005_v21 }
0x1a46   :  { %v1882_v22 = vpop.eup %1881 }
0x1a47   :  { %v1007_v24 = vmul.f32 0.5, %v1882_v22 }
0x1a49   :  { %v1008_v25 = vadd.f32 0.5, %v1007_v24 }
0x1a4b   :  { %v1009_v26 = vsel %vm2090_vm4, %v1882_v22, %v1008_v25 }
0x1a4c   :  { %1015 = vrot.lane.b32.xlu1 %v1009_v26, %s1982_s7  ;;  %v1013_v28 = vmul.f32 %v1011_v12, %v1009_v26 }
0x1abe   :  { %v1016_v27 = vpop.permute.xlu1 %1015 }
0x1abf   :  { %v1018_v2 = vmul.f32 %v1016_v27, %v1009_v26 }
0x1ac1   :  { %1020 = vrot.lane.b32.xlu0 %v1018_v2, %s1988_s24 }
0x1b33   :  { %v1021_v29 = vpop.permute.xlu0 %1020 }
0x1b34   :  { %v1023_v30 = vadd.f32 %v1021_v29, %v1013_v28 }
0x1b36   :  { %1883 = vtanh.f32 %v1023_v30  ;;  %v1090_v47 = vrot.slane %v1023_v30, 7 }
0x1b40   :  { %v1884_v5 = vpop.eup %1883 }
0x1b41   :  { %1026 = vrot.lane.b32.xlu1 %v1884_v5, %s1982_s7 }
0x1bb3   :  { %v1027_v31 = vpop.permute.xlu1 %1026 }
0x1bb4   :  { %v1029_v34 = vmul.f32 %v1027_v31, %v1009_v26 }
0x1bb6   :  { %v1030_v32 = vpack.c.bf16 %v1029_v34, %v1029_v34 }
0x1bb8   :  { %v1032_v23 = vshrl.u32 %v1030_v32, 16 }
0x1bba   :  { %1034 = vrot.lane.b32.xlu0 %v1032_v23, %s1988_s24 }
0x1c2c   :  { %v1035_v15 = vpop.permute.xlu0 %1034 }
0x1c2d   :  { %1776 = vmatmul.mubr.msk.bf16.vlgmr.msra.gmra.mrb[24].mxu0 %vm136_vm5, %v1035_v15 }
0x1c2e   :  { %1788 = vmatpush3.bf16.msra.mxu0 %v2242_v33  ;;  %1791 = vmatprep.mubr.msk.bf16.mxu0 %vm1986_vm0, %v1985_v0 }
0x1c2f   :  { %1789 = vmatprep.subr.bf16.mxu0 %v1985_v0 }
0x1c32   :  { %1790 = vmatpush3.bf16.msra.mxu0 %v2245_v36 }
0x1c33   :  { %1803 = vmatprep.subr.bf16.mxu0 %v1985_v0 }
0x1d00   :  { %v1073_v35 = vpop.f32.mrb[24].mxu0 }
0x1d01   :  { %v1080_v57 = vrot.slane %v1073_v35, 6  ;;  %v1777_v48 = vpop.f32.mrb[25].mxu0 }
0x1d02   :  { %v1076_v37 = vpop.f32.mrb[26].mxu0 }
0x1d03   :  { %v1082_v6 = vadd.f32 %v1080_v57, %v2270_v49  ;;  %v1778_v38 = vpop.f32.mrb[27].mxu0 }
0x1d05   :  { %v1083_v39 = vmul.f32 0.5, %v1082_v6 }
0x1d07   :  { %v1084_v40 = vsel %vm2090_vm4, %v1082_v6, %v1083_v39 }
0x1d08   :  { %1885 = vtanh.f32 %v1084_v40 }
0x1d12   :  { %v1886_v41 = vpop.eup %1885 }
0x1d13   :  { %v1086_v42 = vmul.f32 0.5, %v1886_v41 }
0x1d15   :  { %v1087_v43 = vadd.f32 0.5, %v1086_v42 }
0x1d17   :  { %v1088_v44 = vsel %vm2090_vm4, %v1886_v41, %v1087_v43 }
0x1d18   :  { %1094 = vrot.lane.b32.xlu1 %v1088_v44, %s1982_s7  ;;  %v1092_v50 = vmul.f32 %v1090_v47, %v1088_v44 }
0x1d8a   :  { %v1095_v45 = vpop.permute.xlu1 %1094 }
0x1d8b   :  { %v1097_v46 = vmul.f32 %v1095_v45, %v1088_v44 }
0x1d8d   :  { %1099 = vrot.lane.b32.xlu0 %v1097_v46, %s1988_s24 }
0x1dff   :  { %v1100_v51 = vpop.permute.xlu0 %1099 }
0x1e00   :  { %v1102_v52 = vadd.f32 %v1100_v51, %v1092_v50 }
0x1e02   :  { %1887 = vtanh.f32 %v1102_v52  ;;  %v1168_v16 = vrot.slane %v1102_v52, 7 }
0x1e0c   :  { %v1888_v53 = vpop.eup %1887 }
0x1e0d   :  { %1105 = vrot.lane.b32.xlu1 %v1888_v53, %s1982_s7 }
0x1e7f   :  { %v1106_v54 = vpop.permute.xlu1 %1105 }
0x1e80   :  { %v1108_v55 = vmul.f32 %v1106_v54, %v1088_v44 }
0x1e82   :  { %v1109_v56 = vpack.c.bf16 %v1108_v55, %v1108_v55 }
0x1e84   :  { %v1111_v58 = vrot.slane %v1109_v56, 1 }
0x1e86   :  { %1112 = vrot.lane.b32.xlu0 %v1111_v58, %s1988_s24 }
0x1ef8   :  { %v1113_v59 = vpop.permute.xlu0 %1112 }
0x1ef9   :  { %1784 = vmatmul.mubr.msk.bf16.vlgmr.msra.gmra.mrb[24].mxu1 %vm136_vm5, %v1113_v59 }
0x1efa   :  { %1796 = vmatpush3.bf16.msra.mxu1 %v2242_v33  ;;  %1799 = vmatprep.mubr.msk.bf16.mxu1 %vm1986_vm0, %v1985_v0 }
0x1efb   :  { %1797 = vmatprep.subr.bf16.mxu1 %v1985_v0 }
0x1efe   :  { %1798 = vmatpush3.bf16.msra.mxu1 %v2245_v36 }
0x1eff   :  { %1811 = vmatprep.subr.bf16.mxu1 %v1985_v0 }
0x1fcc   :  { %v1151_v60 = vpop.f32.mrb[24].mxu1 }
0x1fcd   :  { %v1158_v61 = vrot.slane %v1151_v60, 5  ;;  %v1785_v62 = vpop.f32.mrb[25].mxu1 }
0x1fce   :  { %v1154_v63 = vpop.f32.mrb[26].mxu1 }
0x1fcf   :  { %v1160_v1 = vadd.f32 %v1158_v61, %v2270_v49  ;;  %v1786_v3 = vpop.f32.mrb[27].mxu1 }
0x1fd1   :  { %v1161_v4 = vmul.f32 0.5, %v1160_v1 }
0x1fd3   :  { %v1162_v7 = vsel %vm2090_vm4, %v1160_v1, %v1161_v4 }
0x1fd4   :  { %1889 = vtanh.f32 %v1162_v7 }
0x1fde   :  { %v1890_v8 = vpop.eup %1889 }
0x1fdf   :  { %v1164_v9 = vmul.f32 0.5, %v1890_v8 }
0x1fe1   :  { %v1165_v10 = vadd.f32 0.5, %v1164_v9 }
0x1fe3   :  { %v1166_v11 = vsel %vm2090_vm4, %v1890_v8, %v1165_v10 }
0x1fe4   :  { %1172 = vrot.lane.b32.xlu1 %v1166_v11, %s1982_s7  ;;  %v1170_v17 = vmul.f32 %v1168_v16, %v1166_v11 }
0x2056   :  { %v1173_v13 = vpop.permute.xlu1 %1172 }
0x2057   :  { %v1175_v14 = vmul.f32 %v1173_v13, %v1166_v11 }
0x2059   :  { %1177 = vrot.lane.b32.xlu0 %v1175_v14, %s1988_s24 }
0x20cb   :  { %v1178_v19 = vpop.permute.xlu0 %1177 }
0x20cc   :  { %v1180_v20 = vadd.f32 %v1178_v19, %v1170_v17 }
0x20ce   :  { %1891 = vtanh.f32 %v1180_v20  ;;  %v1248_v6 = vrot.slane %v1180_v20, 7 }
0x20d8   :  { %v1892_v21 = vpop.eup %1891 }
0x20d9   :  { %1183 = vrot.lane.b32.xlu1 %v1892_v21, %s1982_s7 }
0x214b   :  { %v1184_v22 = vpop.permute.xlu1 %1183 }
0x214c   :  { %v1186_v24 = vmul.f32 %v1184_v22, %v1166_v11 }
0x214e   :  { %v1187_v25 = vpack.c.bf16 %v1186_v24, %v1186_v24 }
0x2150   :  { %v1189_v26 = vshrl.u32 %v1187_v25, 16 }
0x2152   :  { %v1191_v27 = vrot.slane %v1189_v26, 1 }
0x2154   :  { %1192 = vrot.lane.b32.xlu0 %v1191_v27, %s1988_s24 }
0x21c6   :  { %v1193_v2 = vpop.permute.xlu0 %1192 }
0x21c7   :  { %1792 = vmatmul.mubr.msk.bf16.vlgmr.msra.gmra.mrb[28].mxu0 %vm136_vm5, %v1193_v2 }
0x21c8   :  { %1804 = vmatpush3.bf16.msra.mxu0 %v2242_v33  ;;  %1807 = vmatprep.mubr.msk.bf16.mxu0 %vm1986_vm0, %v1985_v0 }
0x21c9   :  { %1805 = vmatprep.subr.bf16.mxu0 %v1985_v0 }
0x21cc   :  { %1806 = vmatpush3.bf16.msra.mxu0 %v2245_v36 }
0x21cd   :  { %1819 = vmatprep.subr.bf16.mxu0 %v1985_v0 }
0x229a   :  { %v1231_v12 = vpop.f32.mrb[28].mxu0 }
0x229b   :  { %v1238_v28 = vrot.slane %v1231_v12, 4  ;;  %v1793_v29 = vpop.f32.mrb[29].mxu0 }
0x229c   :  { %v1234_v30 = vpop.f32.mrb[30].mxu0 }
0x229d   :  { %v1240_v5 = vadd.f32 %v1238_v28, %v2270_v49  ;;  %v1794_v31 = vpop.f32.mrb[31].mxu0 }
0x229f   :  { %v1241_v34 = vmul.f32 0.5, %v1240_v5 }
0x22a1   :  { %v1242_v32 = vsel %vm2090_vm4, %v1240_v5, %v1241_v34 }
0x22a2   :  { %1893 = vtanh.f32 %v1242_v32 }
0x22ac   :  { %v1894_v23 = vpop.eup %1893 }
0x22ad   :  { %v1244_v15 = vmul.f32 0.5, %v1894_v23 }
0x22af   :  { %v1245_v35 = vadd.f32 0.5, %v1244_v15 }
0x22b1   :  { %v1246_v57 = vsel %vm2090_vm4, %v1894_v23, %v1245_v35 }
0x22b2   :  { %1252 = vrot.lane.b32.xlu1 %v1246_v57, %s1982_s7  ;;  %v1250_v38 = vmul.f32 %v1248_v6, %v1246_v57 }
0x2324   :  { %v1253_v48 = vpop.permute.xlu1 %1252 }
0x2325   :  { %v1255_v37 = vmul.f32 %v1253_v48, %v1246_v57 }
0x2327   :  { %1257 = vrot.lane.b32.xlu0 %v1255_v37, %s1988_s24 }
0x2399   :  { %v1258_v39 = vpop.permute.xlu0 %1257 }
0x239a   :  { %v1260_v40 = vadd.f32 %v1258_v39, %v1250_v38 }
0x239c   :  { %1895 = vtanh.f32 %v1260_v40  ;;  %v1326_v62 = vrot.slane %v1260_v40, 7 }
0x23a6   :  { %v1896_v41 = vpop.eup %1895 }
0x23a7   :  { %1263 = vrot.lane.b32.xlu1 %v1896_v41, %s1982_s7 }
0x2419   :  { %v1264_v42 = vpop.permute.xlu1 %1263 }
0x241a   :  { %v1266_v43 = vmul.f32 %v1264_v42, %v1246_v57 }
0x241c   :  { %v1267_v44 = vpack.c.bf16 %v1266_v43, %v1266_v43 }
0x241e   :  { %v1269_v45 = vrot.slane %v1267_v44, 2 }
0x2420   :  { %1270 = vrot.lane.b32.xlu0 %v1269_v45, %s1988_s24 }
0x2492   :  { %v1271_v46 = vpop.permute.xlu0 %1270 }
0x2493   :  { %1800 = vmatmul.mubr.msk.bf16.vlgmr.msra.gmra.mrb[28].mxu1 %vm136_vm5, %v1271_v46 }
0x2494   :  { %1812 = vmatpush3.bf16.msra.mxu1 %v2242_v33  ;;  %1815 = vmatprep.mubr.msk.bf16.mxu1 %vm1986_vm0, %v1985_v0 }
0x2495   :  { %1813 = vmatprep.subr.bf16.mxu1 %v1985_v0 }
0x2498   :  { %1814 = vmatpush3.bf16.msra.mxu1 %v2245_v36 }
0x2566   :  { %v1309_v47 = vpop.f32.mrb[28].mxu1 }
0x2567   :  { %v1316_v50 = vrot.slane %v1309_v47, 3  ;;  %v1801_v51 = vpop.f32.mrb[29].mxu1 }
0x2568   :  { %v1312_v52 = vpop.f32.mrb[30].mxu1 }
0x2569   :  { %v1318_v53 = vadd.f32 %v1316_v50, %v2270_v49  ;;  %v1802_v54 = vpop.f32.mrb[31].mxu1 }
0x256a   :  { %v1843_v54 = vld [vmem:[%s2409_s4] sm:$0xff]   ;;  %s1989_s4 = smov [#allocation8]  }
0x256b   :  { %v1319_v55 = vmul.f32 0.5, %v1318_v53  ;;  %s1582_s8 = sshll.u32 %s1989_s4, 4  ;;  %s1583_s8 = int_to_ptr.vmem [resolvable:$true] %s1582_s8 }
0x256c   :  { %s1953_s9 = scalar_lea.vmem %s1583_s8, 16  ;;  %s1957_s10 = scalar_lea.vmem %s1583_s8, 32 }
0x256d   :  { %v1320_v56 = vsel %vm2090_vm4, %v1318_v53, %v1319_v55  ;;  %p1954_p2 = scmp.ne.s32.totalorder %s1583_s8, %s1953_s9  ;;  %p1958_p3 = scmp.lt.s32.totalorder %s1583_s8, %s1583_s8 }
0x256e   :  { %1897 = vtanh.f32 %v1320_v56  ;;  %p1959_p4 = scmp.lt.s32.totalorder %s1957_s10, %s1953_s9 }
0x2570   :  { %p1960_p5 = por %p1959_p4, %p1958_p3 }
0x2572   :  { %p1961_p6 = pnand %p1960_p5, %p1954_p2 }
0x2578   :  { %v1898_v33 = vpop.eup %1897 }
0x2579   :  { %v1322_v58 = vmul.f32 0.5, %v1898_v33 }
0x257b   :  { %v1323_v59 = vadd.f32 0.5, %v1322_v58 }
0x257d   :  { %v1324_v60 = vsel %vm2090_vm4, %v1898_v33, %v1323_v59 }
0x257e   :  { %1330 = vrot.lane.b32.xlu1 %v1324_v60, %s1982_s7  ;;  %v1328_v63 = vmul.f32 %v1326_v62, %v1324_v60 }
0x25f0   :  { %v1331_v36 = vpop.permute.xlu1 %1330 }
0x25f1   :  { %v1333_v61 = vmul.f32 %v1331_v36, %v1324_v60 }
0x25f3   :  { %1335 = vrot.lane.b32.xlu0 %v1333_v61, %s1988_s24 }
0x2665   :  { %v1336_v1 = vpop.permute.xlu0 %1335 }
0x2666   :  { %v1338_v3 = vadd.f32 %v1336_v1, %v1328_v63  ;;  %v1511_v63 = vld [vmem:[%s2410_s5] sm:$0x1] }
0x2668   :  { %1899 = vtanh.f32 %v1338_v3  ;;  %v1406_v29 = vrot.slane %v1338_v3, 7 }
0x2672   :  { %v1900_v4 = vpop.eup %1899 }
0x2673   :  { %1341 = vrot.lane.b32.xlu1 %v1900_v4, %s1982_s7 }
0x26e5   :  { %v1342_v7 = vpop.permute.xlu1 %1341 }
0x26e6   :  { %v1344_v8 = vmul.f32 %v1342_v7, %v1324_v60 }
0x26e8   :  { %v1345_v9 = vpack.c.bf16 %v1344_v8, %v1344_v8 }
0x26ea   :  { %v1347_v10 = vshrl.u32 %v1345_v9, 16 }
0x26ec   :  { %v1349_v11 = vrot.slane %v1347_v10, 2 }
0x26ee   :  { %1350 = vrot.lane.b32.xlu0 %v1349_v11, %s1988_s24 }
0x2760   :  { %v1351_v13 = vpop.permute.xlu0 %1350 }
0x2761   :  { %1808 = vmatmul.mubr.msk.bf16.vlgmr.msra.gmra.mrb[32].mxu0 %vm136_vm5, %v1351_v13 }
0x2762   :  { %1823 = vmatprep.mubr.msk.bf16.mxu0 %vm1986_vm0, %v1985_v0  ;;  %1820 = vmatpush3.bf16.msra.mxu0 %v1843_v54 }
0x2763   :  { %1821 = vmatprep.subr.bf16.mxu0 %v1985_v0 }
0x2766   :  { %1822 = vmatpush3.bf16.msra.mxu0 %v1844_v18 }
0x2834   :  { %v1389_v14 = vpop.f32.mrb[32].mxu0 }
0x2835   :  { %v1396_v16 = vrot.slane %v1389_v14, 2  ;;  %v1809_v17 = vpop.f32.mrb[33].mxu0 }
0x2836   :  { %v1392_v19 = vpop.f32.mrb[34].mxu0 }
0x2837   :  { %v1398_v20 = vadd.f32 %v1396_v16, %v2270_v49  ;;  %v1810_v21 = vpop.f32.mrb[35].mxu0 }
0x2839   :  { %v1399_v22 = vmul.f32 0.5, %v1398_v20 }
0x283b   :  { %v1400_v24 = vsel %vm2090_vm4, %v1398_v20, %v1399_v22 }
0x283c   :  { %1901 = vtanh.f32 %v1400_v24 }
0x2846   :  { %v1902_v25 = vpop.eup %1901 }
0x2847   :  { %v1402_v26 = vmul.f32 0.5, %v1902_v25 }
0x2849   :  { %v1403_v27 = vadd.f32 0.5, %v1402_v26 }
0x284b   :  { %v1404_v2 = vsel %vm2090_vm4, %v1902_v25, %v1403_v27 }
0x284c   :  { %1410 = vrot.lane.b32.xlu1 %v1404_v2, %s1982_s7  ;;  %v1408_v30 = vmul.f32 %v1406_v29, %v1404_v2 }
0x28be   :  { %v1411_v12 = vpop.permute.xlu1 %1410 }
0x28bf   :  { %v1413_v28 = vmul.f32 %v1411_v12, %v1404_v2 }
0x28c1   :  { %1415 = vrot.lane.b32.xlu0 %v1413_v28, %s1988_s24 }
0x2933   :  { %v1416_v5 = vpop.permute.xlu0 %1415 }
0x2934   :  { %v1418_v31 = vadd.f32 %v1416_v5, %v1408_v30 }
0x2936   :  { %1903 = vtanh.f32 %v1418_v31  ;;  %v1484_v51 = vrot.slane %v1418_v31, 7 }
0x2940   :  { %v1904_v34 = vpop.eup %1903 }
0x2941   :  { %1421 = vrot.lane.b32.xlu1 %v1904_v34, %s1982_s7 }
0x29b3   :  { %v1422_v32 = vpop.permute.xlu1 %1421 }
0x29b4   :  { %v1424_v23 = vmul.f32 %v1422_v32, %v1404_v2 }
0x29b6   :  { %v1425_v15 = vpack.c.bf16 %v1424_v23, %v1424_v23 }
0x29b8   :  { %v1427_v35 = vrot.slane %v1425_v15, 3 }
0x29ba   :  { %1428 = vrot.lane.b32.xlu0 %v1427_v35, %s1988_s24 }
0x2a2c   :  { %v1429_v57 = vpop.permute.xlu0 %1428 }
0x2a2d   :  { %1816 = vmatmul.mubr.msk.bf16.vlgmr.msra.gmra.mrb[32].mxu1 %vm136_vm5, %v1429_v57 }
0x2b00   :  { %v1467_v48 = vpop.f32.mrb[32].mxu1 }
0x2b01   :  { %v1474_v37 = vrot.slane %v1467_v48, 1  ;;  %v1817_v6 = vpop.f32.mrb[33].mxu1 }
0x2b02   :  { %v1470_v38 = vpop.f32.mrb[34].mxu1 }
0x2b03   :  { %v1476_v39 = vadd.f32 %v1474_v37, %v2270_v49  ;;  %v1818_v40 = vpop.f32.mrb[35].mxu1 }
0x2b05   :  { %v1477_v41 = vmul.f32 0.5, %v1476_v39 }
0x2b07   :  { %v1478_v42 = vsel %vm2090_vm4, %v1476_v39, %v1477_v41 }
0x2b08   :  { %1905 = vtanh.f32 %v1478_v42 }
0x2b12   :  { %v1906_v43 = vpop.eup %1905 }
0x2b13   :  { %v1480_v44 = vmul.f32 0.5, %v1906_v43 }
0x2b15   :  { %v1481_v45 = vadd.f32 0.5, %v1480_v44 }
0x2b17   :  { %v1482_v46 = vsel %vm2090_vm4, %v1906_v43, %v1481_v45 }
0x2b18   :  { %1488 = vrot.lane.b32.xlu1 %v1482_v46, %s1982_s7  ;;  %v1486_v49 = vmul.f32 %v1484_v51, %v1482_v46 }
0x2b8a   :  { %v1489_v47 = vpop.permute.xlu1 %1488 }
0x2b8b   :  { %v1491_v50 = vmul.f32 %v1489_v47, %v1482_v46 }
0x2b8d   :  { %1493 = vrot.lane.b32.xlu0 %v1491_v50, %s1988_s24 }
0x2bff   :  { %v1494_v52 = vpop.permute.xlu0 %1493 }
0x2c00   :  { %v1496_v53 = vadd.f32 %v1494_v52, %v1486_v49 }
0x2c02   :  { %1907 = vtanh.f32 %v1496_v53 }
0x2c0c   :  { %v1908_v55 = vpop.eup %1907 }
0x2c0d   :  { %1499 = vrot.lane.b32.xlu1 %v1908_v55, %s1982_s7 }
0x2c7f   :  { %v1500_v56 = vpop.permute.xlu1 %1499 }
0x2c80   :  { %v1502_v33 = vmul.f32 %v1500_v56, %v1482_v46 }
0x2c82   :  { %vm1503_vm14 = vcmp.ge.f32.partialorder %v1502_v33, 0.0  ;;  %v1504_v58 = vmul.f32 0.01, %v1502_v33 }
0x2c84   :  { %v1505_v59 = vsel %vm1503_vm14, %v1502_v33, %v1504_v58 }
0x2c85   :  { %v1506_v60 = vpack.c.bf16 %v1505_v59, %v1505_v59 }
0x2c87   :  { %v1513_v36 = vshrl.u32 %v1506_v60, 16 }
0x2c89   :  { %v1515_v61 = vrot.slane %v1513_v36, 3 }
0x2c8b   :  { %1516 = vrot.lane.b32.xlu0 %v1515_v61, %s1988_s24 }
0x2cfd   :  { %v1517_v62 = vpop.permute.xlu0 %1516 }
0x2cfe   :  { %1824 = vmatmul.mubr.msk.bf16.vlgmr.msra.gmra.mrb[36].mxu0 %vm136_vm5, %v1517_v62 }
0x2dd1   :  { %v1567_v1 = vpop.f32.mrb[36].mxu0 }
0x2dd2   :  { %v1568_v0 = vadd.f32 %v1567_v1, %v1511_v63  ;;  %v1825_v3 = vpop.f32.mrb[37].mxu0 }
0x2dd3   :  { %v1570_v4 = vpop.f32.mrb[38].mxu0 }
0x2dd4   :  { %v1573_v7 = vmax.f32 %v1568_v0, 0.0  ;;  %v1826_v8 = vpop.f32.mrb[39].mxu0 }
0x2dd6   :  { %1575 = vst.msk [vmem:[#allocation8] sm:$0x1] %vm1574_vm15, %v1573_v7 }
0x2dd7   :  { %1964 = shalt.err (!%p1961_p6)
}
0x2dd8   :  { %s1965_s12 = scalar_lea.hbm %s2411_s6, 16 }
0x2dd9   :  { %p1966_p7 = scmp.ne.s32.totalorder %s2411_s6, %s1965_s12  ;;  %p1969_p8 = scmp.lt.u32.totalorder %s1965_s12, %s2411_s6 }
0x2ddb   :  { %p1971_p9 = pnand %p1969_p8, %p1966_p7 }
0x2ddd   :  { %1974 = shalt.err (!%p1971_p9)
}
0x2dde   :  { %1585 = dma.vmem_to_hbm [thread:$0]  %s1583_s8, 16, %s2411_s6, [#allocation5]  }
0x2ddf   :  { %1979 = dma.done.wait [#allocation5], 16  }
0x2de0   :  { %1980 = vsyncadd [#allocation5], 4294967280 }
0x2de1   :  { %1589 = vsyncpa [#allocation4], 1 }
0x2de2   :  { %1590 = vsyncpa [#allocation7], 1 }
0x2de3   :  { %1591 = vsyncpa [#allocation5], 1 }

</bundles_post_ra>
